<compile_context>
chip_gen: v7x
topology: tpu7x:2x2x1
jax: 0.10.0
libtpu: 0.0.40
codegen_flags: <defaults>
</compile_context>

<pallas_src>
import jax
import jax.numpy as jnp
import numpy as np
from jax.experimental import pallas as pl
from jax.experimental.pallas import tpu as pltpu


# --------------------------------------------------------------------------- #
# Kernel
# --------------------------------------------------------------------------- #
def _ca_kernel(x_ref, w1_ref, b1_ref, wh_ref, bh_ref, ww_ref, bw_ref,
               p_ref, ps_ref, eh_ref, ew_ref, out_ref):
    """One grid step: a (b_blk, C, H*W) lane-dense slab, fully block-batched."""
    bb, c, hw = x_ref.shape
    h = eh_ref.shape[0]
    w = ew_ref.shape[0]
    mip = w1_ref.shape[0]

    x = x_ref[...].reshape(bb * c, hw)                     # (B*C, HW) f32
    xb = x.astype(jnp.bfloat16)                            # MXU operand

    # ---- coordinate pooling: ONE MXU matmul, M = B*C, N = H+W --------------
    pooled = jnp.dot(xb, p_ref[...],                       # 0/1 bf16 matrix
                     preferred_element_type=jnp.float32)   # (B*C, H+W) raw sums
    pooled = pooled.reshape(bb, c, h + w).astype(jnp.bfloat16)

    # ---- conv1 (1x1, BN folded) on the fused H|W tile (batched matmul) -----
    w1b = jnp.broadcast_to(w1_ref[...], (bb, mip, c))
    y = jax.lax.dot_general(w1b, pooled,
                            (((2,), (1,)), ((0,), (0,))),
                            preferred_element_type=jnp.float32)   # (B, mip, H+W)
    # per-column 1/W | 1/H pooling scale (f32, exact), then bias
    y = y * ps_ref[...][None] + b1_ref[...][None]
    # h_swish: y * relu6(y + 3) / 6 (f32 elementwise)
    y = y * jnp.clip(y + 3.0, 0.0, 6.0) * (1.0 / 6.0)
    y = y.astype(jnp.bfloat16)

    # ---- split branches on the tiny tensor, conv_h / conv_w + sigmoid ------
    yh = y[:, :, :h]                                       # (B, mip, H)
    yw = y[:, :, h:]                                       # (B, mip, W)
    whb = jnp.broadcast_to(wh_ref[...], (bb, c, mip))
    wwb = jnp.broadcast_to(ww_ref[...], (bb, c, mip))
    ah = jax.nn.sigmoid(
        jax.lax.dot_general(whb, yh, (((2,), (1,)), ((0,), (0,))),
                            preferred_element_type=jnp.float32)
        + bh_ref[...][None])                               # (B, C, H) f32
    aw = jax.nn.sigmoid(
        jax.lax.dot_general(wwb, yw, (((2,), (1,)), ((0,), (0,))),
                            preferred_element_type=jnp.float32)
        + bw_ref[...][None])                               # (B, C, W) f32

    # ---- gate expansion: 2-D MXU matmuls, M = B*C, lane-dense 0/1 rhs ------
    ahf = jnp.dot(ah.astype(jnp.bfloat16).reshape(bb * c, h), eh_ref[...],
                  preferred_element_type=jnp.float32)       # (B*C, HW)
    awf = jnp.dot(aw.astype(jnp.bfloat16).reshape(bb * c, w), ew_ref[...],
                  preferred_element_type=jnp.float32)       # (B*C, HW)

    # ---- out = identity * a_h * a_w : full-width VPU multiply + vst --------
    out_ref[...] = (x * ahf * awf).reshape(bb, c, hw).astype(out_ref.dtype)


# --------------------------------------------------------------------------- #
# Sizing helpers
# --------------------------------------------------------------------------- #
def _vmem_capacity_bytes():
    try:
        return int(pltpu.get_tpu_info().vmem_capacity_bytes)
    except Exception:
        return 64 * 1024 * 1024     # conservative: v7x per-TensorCore VMEM


def _padded_bytes(arr):
    """VMEM footprint including (sublane, lane) padding."""
    shape = tuple(int(s) for s in arr.shape)
    esize = jnp.dtype(arr.dtype).itemsize
    if len(shape) == 0:
        shape = (1, 1)
    elif len(shape) == 1:
        shape = (1, shape[0])
    sub_mult = 8 * max(1, 4 // esize)           # f32: 8, bf16: 16
    lanes = -(-shape[-1] // 128) * 128
    subs = -(-shape[-2] // sub_mult) * sub_mult
    lead = 1
    for s in shape[:-2]:
        lead *= s
    return lead * subs * lanes * esize


def _pick_batch_block(n, per_batch_bytes, budget_bytes, max_block=8):
    """Largest divisor of n fitting the VMEM budget while keeping grid >= 2."""
    cap = max(1, min(max_block, budget_bytes // max(per_batch_bytes, 1)))
    best = 1
    for cand in range(1, n + 1):
        if n % cand:
            continue
        if cand > cap:
            continue
        if n >= 2 and n // cand < 2:    # grid >= 2: pipelining + megacore
            continue
        best = cand
    return best


# --------------------------------------------------------------------------- #
# Wrapper
# --------------------------------------------------------------------------- #
def ca_forward(x, params, *, eps=1e-5):
    """Coordinate Attention forward.  x: (N, C, H, W) float32."""
    n, c, h, w = x.shape
    hw = h * w
    l = h + w
    f32, bf16 = jnp.float32, jnp.bfloat16

    # ---- fold BatchNorm (inference, running stats) into conv1 ---------------
    scale = params["gamma"] * jax.lax.rsqrt(params["var"] + eps)       # (mip,1)
    w1f = (params["w1"] * scale).astype(bf16)                          # (mip,C)
    b1f = (scale * (params["b1"] - params["mean"]) + params["beta"]).astype(f32)

    # ---- host-built 0/1 pooling / expansion matrices (bf16-exact) -----------
    idx = np.arange(hw)
    p = np.zeros((hw, l), np.float32)
    p[idx, idx // w] = 1.0                    # H branch: sum over W
    p[idx, h + (idx % w)] = 1.0               # W branch: sum over H
    ps = np.concatenate([np.full(h, 1.0 / w, np.float32),
                         np.full(w, 1.0 / h, np.float32)]).reshape(1, l)
    eh = np.zeros((h, hw), np.float32); eh[idx // w, idx] = 1.0
    ew = np.zeros((w, hw), np.float32); ew[idx % w, idx] = 1.0

    operands = [
        w1f, b1f,
        params["wh"].astype(bf16), params["bh"].astype(f32),
        params["ww"].astype(bf16), params["bw"].astype(f32),
        jnp.asarray(p, bf16), jnp.asarray(ps, f32),
        jnp.asarray(eh, bf16), jnp.asarray(ew, bf16),
    ]

    # ---- generation-aware VMEM budget and batch-block choice ----------------
    vmem_cap = _vmem_capacity_bytes()
    vmem_target = min(int(vmem_cap * 0.7), 96 * 1024 * 1024)
    const_bytes = 2 * sum(_padded_bytes(a) for a in operands)  # worst case 2x-buffered
    # per-batch resident estimate: f32 in+out double-buffered + bf16/f32 temporaries
    per_batch = int(c * hw * 4 * 7)
    b_blk = _pick_batch_block(n, per_batch,
                              max(vmem_target - const_bytes, per_batch))
    grid = (n // b_blk,)

    need = b_blk * per_batch + const_bytes + (4 << 20)
    vmem_limit = int(min(max(need, 32 << 20), int(vmem_cap * 0.9)))

    x_flat = x.reshape(n, c, hw)                      # lane-dense (C, H*W) slabs
    io_spec = pl.BlockSpec((b_blk, c, hw), lambda i: (i, 0, 0))

    def _call(single_buffer_consts):
        def const_spec(arr):
            nd = arr.ndim
            kw = {}
            if single_buffer_consts:
                kw["pipeline_mode"] = pl.Buffered(buffer_count=1)
            return pl.BlockSpec(arr.shape, lambda i, _nd=nd: (0,) * _nd, **kw)

        return pl.pallas_call(
            _ca_kernel,
            out_shape=jax.ShapeDtypeStruct((n, c, hw), x.dtype),
            grid=grid,
            in_specs=[io_spec] + [const_spec(a) for a in operands],
            out_specs=io_spec,
            compiler_params=pltpu.CompilerParams(
                dimension_semantics=("parallel",),
                vmem_limit_bytes=vmem_limit),
        )(x_flat, *operands)

    try:
        out_flat = _call(True)
    except Exception:
        # This JAX build does not accept single-buffered pipeline_mode;
        # fall back to default double-buffered constants.
        out_flat = _call(False)

    return out_flat.reshape(n, c, h, w)


# --------------------------------------------------------------------------- #
# Parameters + pure-JAX reference
# --------------------------------------------------------------------------- #
def init_params(key, inp, reduction=32):
    """Deterministic synthetic parameters matching CA.__init__ shapes."""
    oup = inp
    mip = max(8, inp // reduction)
    ks = jax.random.split(key, 8)
    scale1 = 1.0 / np.sqrt(inp)
    scale2 = 1.0 / np.sqrt(mip)
    return {
        # conv1: (mip, inp, 1, 1) -> (mip, inp); bias (mip,) -> (mip, 1)
        "w1": jax.random.normal(ks[0], (mip, inp), jnp.float32) * scale1,
        "b1": jax.random.normal(ks[1], (mip, 1), jnp.float32) * scale1,
        # bn1 affine + running stats (inference mode)
        "gamma": jnp.ones((mip, 1), jnp.float32),
        "beta": jnp.zeros((mip, 1), jnp.float32),
        "mean": jnp.zeros((mip, 1), jnp.float32),
        "var": jnp.ones((mip, 1), jnp.float32),
        # conv_h / conv_w: (oup, mip, 1, 1) -> (oup, mip); bias (oup,) -> (oup, 1)
        "wh": jax.random.normal(ks[2], (oup, mip), jnp.float32) * scale2,
        "bh": jax.random.normal(ks[3], (oup, 1), jnp.float32) * scale2,
        "ww": jax.random.normal(ks[4], (oup, mip), jnp.float32) * scale2,
        "bw": jax.random.normal(ks[5], (oup, 1), jnp.float32) * scale2,
    }


def ca_reference(x, params, *, eps=1e-5):
    """Pure-JAX f32 reference of the PyTorch CA.forward (BN in inference mode)."""
    n, c, h, w = x.shape
    x_h = jnp.mean(x, axis=3)                       # (N, C, H)
    x_w = jnp.mean(x, axis=2)                       # (N, C, W)
    y = jnp.concatenate([x_h, x_w], axis=2)         # (N, C, H+W)
    y = jnp.einsum("mc,ncl->nml", params["w1"], y) + params["b1"][None]
    y = (y - params["mean"][None]) / jnp.sqrt(params["var"][None] + eps)
    y = y * params["gamma"][None] + params["beta"][None]
    y = y * jnp.clip(y + 3.0, 0.0, 6.0) / 6.0
    y_h, y_w = y[:, :, :h], y[:, :, h:]
    a_h = jax.nn.sigmoid(jnp.einsum("cm,nml->ncl", params["wh"], y_h) + params["bh"][None])
    a_w = jax.nn.sigmoid(jnp.einsum("cm,nml->ncl", params["ww"], y_w) + params["bw"][None])
    return x * a_h[:, :, :, None] * a_w[:, :, None, :]


if __name__ == "__main__":
    key = jax.random.PRNGKey(0)
    k_x, k_p = jax.random.split(key)

    N, C, H, W = 4, 16, 16, 16                      # mip = max(8, 16 // 32) = 8
    x = jax.random.normal(k_x, (N, C, H, W), jnp.float32)
    params = init_params(k_p, C, reduction=32)

    out = jax.block_until_ready(ca_forward(x, params))
    ref = jax.block_until_ready(ca_reference(x, params))

    # bf16 MXU operands (per perf review) -> ~1% tolerance vs the f32 reference;
    # all elementwise math and accumulation stay f32.
    np.testing.assert_allclose(np.asarray(out), np.asarray(ref), rtol=1e-2, atol=1e-2)

    print("KERNEL_OK")
</pallas_src>

<mosaic_0001>
module attributes {stable_mosaic.version = 11 : i64} {
  func.func @_ca_kernel(%arg0: i32, %arg1: memref<2x16x256xf32, #tpu.memory_space<vmem>>, %arg2: memref<8x16xbf16, #tpu.memory_space<vmem>>, %arg3: memref<8x1xf32, #tpu.memory_space<vmem>>, %arg4: memref<16x8xbf16, #tpu.memory_space<vmem>>, %arg5: memref<16x1xf32, #tpu.memory_space<vmem>>, %arg6: memref<16x8xbf16, #tpu.memory_space<vmem>>, %arg7: memref<16x1xf32, #tpu.memory_space<vmem>>, %arg8: memref<256x32xbf16, #tpu.memory_space<vmem>>, %arg9: memref<1x32xf32, #tpu.memory_space<vmem>>, %arg10: memref<16x256xbf16, #tpu.memory_space<vmem>>, %arg11: memref<16x256xbf16, #tpu.memory_space<vmem>>, %arg12: memref<2x16x256xf32, #tpu.memory_space<vmem>>) attributes {dimension_semantics = [#tpu.dimension_semantics<parallel>], iteration_bounds = array<i64: 2>, scalar_prefetch = 0 : i64, scratch_operands = 0 : i64, tpu.core_type = #tpu.core_type<tc>, window_params = [{transform_indices = @transform_0, window_bounds = array<i64: 2, 16, 256>}, {pipeline_mode = #tpu.pipeline_mode<synchronous>, transform_indices = @transform_1, window_bounds = array<i64: 8, 16>}, {pipeline_mode = #tpu.pipeline_mode<synchronous>, transform_indices = @transform_2, window_bounds = array<i64: 8, 1>}, {pipeline_mode = #tpu.pipeline_mode<synchronous>, transform_indices = @transform_3, window_bounds = array<i64: 16, 8>}, {pipeline_mode = #tpu.pipeline_mode<synchronous>, transform_indices = @transform_4, window_bounds = array<i64: 16, 1>}, {pipeline_mode = #tpu.pipeline_mode<synchronous>, transform_indices = @transform_5, window_bounds = array<i64: 16, 8>}, {pipeline_mode = #tpu.pipeline_mode<synchronous>, transform_indices = @transform_6, window_bounds = array<i64: 16, 1>}, {pipeline_mode = #tpu.pipeline_mode<synchronous>, transform_indices = @transform_7, window_bounds = array<i64: 256, 32>}, {pipeline_mode = #tpu.pipeline_mode<synchronous>, transform_indices = @transform_8, window_bounds = array<i64: 1, 32>}, {pipeline_mode = #tpu.pipeline_mode<synchronous>, transform_indices = @transform_9, window_bounds = array<i64: 16, 256>}, {pipeline_mode = #tpu.pipeline_mode<synchronous>, transform_indices = @transform_10, window_bounds = array<i64: 16, 256>}, {transform_indices = @transform_11, window_bounds = array<i64: 2, 16, 256>}]} {
    %c0 = arith.constant 0 : index
    %c0_0 = arith.constant 0 : index
    %c0_1 = arith.constant 0 : index
    %0 = vector.load %arg1[%c0, %c0_0, %c0_1] : memref<2x16x256xf32, #tpu.memory_space<vmem>>, vector<2x16x256xf32>
    %1 = vector.shape_cast %0 : vector<2x16x256xf32> to vector<32x256xf32>
    %2 = arith.truncf %1 : vector<32x256xf32> to vector<32x256xbf16>
    %c0_2 = arith.constant 0 : index
    %c0_3 = arith.constant 0 : index
    %3 = vector.load %arg8[%c0_2, %c0_3] : memref<256x32xbf16, #tpu.memory_space<vmem>>, vector<256x32xbf16>
    %cst = arith.constant dense<0.000000e+00> : vector<32x32xf32>
    %4 = tpu.matmul %2, %3, %cst {dimension_numbers = #tpu.dot_dimension_numbers<[1], [0], [0], [1], [0, 0, 1, 1], [], []>} : vector<32x256xbf16>, vector<256x32xbf16>, vector<32x32xf32> -> vector<32x32xf32>
    %5 = vector.shape_cast %4 : vector<32x32xf32> to vector<2x16x32xf32>
    %6 = arith.truncf %5 : vector<2x16x32xf32> to vector<2x16x32xbf16>
    %c0_4 = arith.constant 0 : index
    %c0_5 = arith.constant 0 : index
    %7 = vector.load %arg2[%c0_4, %c0_5] : memref<8x16xbf16, #tpu.memory_space<vmem>>, vector<8x16xbf16>
    %8 = vector.shape_cast %7 : vector<8x16xbf16> to vector<1x8x16xbf16>
    %9 = vector.broadcast %8 : vector<1x8x16xbf16> to vector<2x8x16xbf16>
    %cst_6 = arith.constant dense<0.000000e+00> : vector<2x8x32xf32>
    %10 = tpu.matmul %9, %6, %cst_6 {dimension_numbers = #tpu.dot_dimension_numbers<[2], [1], [1], [2], [0, 0, 0, 1, 1, 2], [0], [0]>} : vector<2x8x16xbf16>, vector<2x16x32xbf16>, vector<2x8x32xf32> -> vector<2x8x32xf32>
    %c0_7 = arith.constant 0 : index
    %c0_8 = arith.constant 0 : index
    %11 = vector.load %arg9[%c0_7, %c0_8] : memref<1x32xf32, #tpu.memory_space<vmem>>, vector<1x32xf32>
    %12 = vector.shape_cast %11 : vector<1x32xf32> to vector<1x1x32xf32>
    %13 = vector.broadcast %12 : vector<1x1x32xf32> to vector<2x8x32xf32>
    %14 = arith.mulf %10, %13 : vector<2x8x32xf32>
    %c0_9 = arith.constant 0 : index
    %c0_10 = arith.constant 0 : index
    %15 = vector.load %arg3[%c0_9, %c0_10] : memref<8x1xf32, #tpu.memory_space<vmem>>, vector<8x1xf32>
    %16 = vector.shape_cast %15 : vector<8x1xf32> to vector<1x8x1xf32>
    %17 = vector.broadcast %16 : vector<1x8x1xf32> to vector<2x8x32xf32>
    %18 = arith.addf %14, %17 : vector<2x8x32xf32>
    %cst_11 = arith.constant 3.000000e+00 : f32
    %19 = vector.broadcast %cst_11 : f32 to vector<2x8x32xf32>
    %20 = arith.addf %18, %19 : vector<2x8x32xf32>
    %cst_12 = arith.constant 0.000000e+00 : f32
    %cst_13 = arith.constant 6.000000e+00 : f32
    %21 = vector.broadcast %cst_12 : f32 to vector<2x8x32xf32>
    %22 = arith.maximumf %21, %20 : vector<2x8x32xf32>
    %23 = vector.broadcast %cst_13 : f32 to vector<2x8x32xf32>
    %24 = arith.minimumf %23, %22 : vector<2x8x32xf32>
    %25 = arith.mulf %18, %24 : vector<2x8x32xf32>
    %cst_14 = arith.constant 0.166666672 : f32
    %26 = vector.broadcast %cst_14 : f32 to vector<2x8x32xf32>
    %27 = arith.mulf %25, %26 : vector<2x8x32xf32>
    %28 = arith.truncf %27 : vector<2x8x32xf32> to vector<2x8x32xbf16>
    %29 = vector.extract_strided_slice %28 {offsets = [0, 0, 0], sizes = [2, 8, 16], strides = [1, 1, 1]} : vector<2x8x32xbf16> to vector<2x8x16xbf16>
    %30 = vector.extract_strided_slice %28 {offsets = [0, 0, 16], sizes = [2, 8, 16], strides = [1, 1, 1]} : vector<2x8x32xbf16> to vector<2x8x16xbf16>
    %c0_15 = arith.constant 0 : index
    %c0_16 = arith.constant 0 : index
    %31 = vector.load %arg4[%c0_15, %c0_16] : memref<16x8xbf16, #tpu.memory_space<vmem>>, vector<16x8xbf16>
    %32 = vector.shape_cast %31 : vector<16x8xbf16> to vector<1x16x8xbf16>
    %33 = vector.broadcast %32 : vector<1x16x8xbf16> to vector<2x16x8xbf16>
    %c0_17 = arith.constant 0 : index
    %c0_18 = arith.constant 0 : index
    %34 = vector.load %arg6[%c0_17, %c0_18] : memref<16x8xbf16, #tpu.memory_space<vmem>>, vector<16x8xbf16>
    %35 = vector.shape_cast %34 : vector<16x8xbf16> to vector<1x16x8xbf16>
    %36 = vector.broadcast %35 : vector<1x16x8xbf16> to vector<2x16x8xbf16>
    %cst_19 = arith.constant dense<0.000000e+00> : vector<2x16x16xf32>
    %37 = tpu.matmul %33, %29, %cst_19 {dimension_numbers = #tpu.dot_dimension_numbers<[2], [1], [1], [2], [0, 0, 0, 1, 1, 2], [0], [0]>} : vector<2x16x8xbf16>, vector<2x8x16xbf16>, vector<2x16x16xf32> -> vector<2x16x16xf32>
    %c0_20 = arith.constant 0 : index
    %c0_21 = arith.constant 0 : index
    %38 = vector.load %arg5[%c0_20, %c0_21] : memref<16x1xf32, #tpu.memory_space<vmem>>, vector<16x1xf32>
    %39 = vector.shape_cast %38 : vector<16x1xf32> to vector<1x16x1xf32>
    %40 = vector.broadcast %39 : vector<1x16x1xf32> to vector<2x16x16xf32>
    %41 = arith.addf %37, %40 : vector<2x16x16xf32>
    %42 = arith.negf %41 : vector<2x16x16xf32>
    %43 = math.exp %42 : vector<2x16x16xf32>
    %cst_22 = arith.constant 1.000000e+00 : f32
    %44 = vector.broadcast %cst_22 : f32 to vector<2x16x16xf32>
    %45 = arith.addf %44, %43 : vector<2x16x16xf32>
    %46 = arith.divf %44, %45 : vector<2x16x16xf32>
    %cst_23 = arith.constant dense<0.000000e+00> : vector<2x16x16xf32>
    %47 = tpu.matmul %36, %30, %cst_23 {dimension_numbers = #tpu.dot_dimension_numbers<[2], [1], [1], [2], [0, 0, 0, 1, 1, 2], [0], [0]>} : vector<2x16x8xbf16>, vector<2x8x16xbf16>, vector<2x16x16xf32> -> vector<2x16x16xf32>
    %c0_24 = arith.constant 0 : index
    %c0_25 = arith.constant 0 : index
    %48 = vector.load %arg7[%c0_24, %c0_25] : memref<16x1xf32, #tpu.memory_space<vmem>>, vector<16x1xf32>
    %49 = vector.shape_cast %48 : vector<16x1xf32> to vector<1x16x1xf32>
    %50 = vector.broadcast %49 : vector<1x16x1xf32> to vector<2x16x16xf32>
    %51 = arith.addf %47, %50 : vector<2x16x16xf32>
    %52 = arith.negf %51 : vector<2x16x16xf32>
    %53 = math.exp %52 : vector<2x16x16xf32>
    %cst_26 = arith.constant 1.000000e+00 : f32
    %54 = vector.broadcast %cst_26 : f32 to vector<2x16x16xf32>
    %55 = arith.addf %54, %53 : vector<2x16x16xf32>
    %56 = arith.divf %54, %55 : vector<2x16x16xf32>
    %57 = arith.truncf %46 : vector<2x16x16xf32> to vector<2x16x16xbf16>
    %58 = vector.shape_cast %57 : vector<2x16x16xbf16> to vector<32x16xbf16>
    %c0_27 = arith.constant 0 : index
    %c0_28 = arith.constant 0 : index
    %59 = vector.load %arg10[%c0_27, %c0_28] : memref<16x256xbf16, #tpu.memory_space<vmem>>, vector<16x256xbf16>
    %cst_29 = arith.constant dense<0.000000e+00> : vector<32x256xf32>
    %60 = tpu.matmul %58, %59, %cst_29 {dimension_numbers = #tpu.dot_dimension_numbers<[1], [0], [0], [1], [0, 0, 1, 1], [], []>} : vector<32x16xbf16>, vector<16x256xbf16>, vector<32x256xf32> -> vector<32x256xf32>
    %61 = arith.truncf %56 : vector<2x16x16xf32> to vector<2x16x16xbf16>
    %62 = vector.shape_cast %61 : vector<2x16x16xbf16> to vector<32x16xbf16>
    %c0_30 = arith.constant 0 : index
    %c0_31 = arith.constant 0 : index
    %63 = vector.load %arg11[%c0_30, %c0_31] : memref<16x256xbf16, #tpu.memory_space<vmem>>, vector<16x256xbf16>
    %cst_32 = arith.constant dense<0.000000e+00> : vector<32x256xf32>
    %64 = tpu.matmul %62, %63, %cst_32 {dimension_numbers = #tpu.dot_dimension_numbers<[1], [0], [0], [1], [0, 0, 1, 1], [], []>} : vector<32x16xbf16>, vector<16x256xbf16>, vector<32x256xf32> -> vector<32x256xf32>
    %65 = arith.mulf %1, %60 : vector<32x256xf32>
    %66 = arith.mulf %65, %64 : vector<32x256xf32>
    %67 = vector.shape_cast %66 : vector<32x256xf32> to vector<2x16x256xf32>
    %c0_33 = arith.constant 0 : index
    %c0_34 = arith.constant 0 : index
    %c0_35 = arith.constant 0 : index
    %68 = vector.load %arg12[%c0_33, %c0_34, %c0_35] : memref<2x16x256xf32, #tpu.memory_space<vmem>>, vector<2x16x256xf32>
    tpu.vector_store %arg12[%c0_33, %c0_34, %c0_35], %67 {strides = array<i32>} : memref<2x16x256xf32, #tpu.memory_space<vmem>>, vector<2x16x256xf32>,
    return
  }
  func.func @transform_0(%arg0: i32) -> (i32, i32, i32) {
    %c0_i32 = arith.constant 0 : i32
    %c0_i32_0 = arith.constant 0 : i32
    %c0_i32_1 = arith.constant 0 : i32
    return %arg0, %c0_i32, %c0_i32_0 : i32, i32, i32
  }
  func.func @transform_1(%arg0: i32) -> (i32, i32) {
    %c0_i32 = arith.constant 0 : i32
    %c0_i32_0 = arith.constant 0 : i32
    %c0_i32_1 = arith.constant 0 : i32
    return %c0_i32, %c0_i32_0 : i32, i32
  }
  func.func @transform_2(%arg0: i32) -> (i32, i32) {
    %c0_i32 = arith.constant 0 : i32
    %c0_i32_0 = arith.constant 0 : i32
    %c0_i32_1 = arith.constant 0 : i32
    return %c0_i32, %c0_i32_0 : i32, i32
  }
  func.func @transform_3(%arg0: i32) -> (i32, i32) {
    %c0_i32 = arith.constant 0 : i32
    %c0_i32_0 = arith.constant 0 : i32
    %c0_i32_1 = arith.constant 0 : i32
    return %c0_i32, %c0_i32_0 : i32, i32
  }
  func.func @transform_4(%arg0: i32) -> (i32, i32) {
    %c0_i32 = arith.constant 0 : i32
    %c0_i32_0 = arith.constant 0 : i32
    %c0_i32_1 = arith.constant 0 : i32
    return %c0_i32, %c0_i32_0 : i32, i32
  }
  func.func @transform_5(%arg0: i32) -> (i32, i32) {
    %c0_i32 = arith.constant 0 : i32
    %c0_i32_0 = arith.constant 0 : i32
    %c0_i32_1 = arith.constant 0 : i32
    return %c0_i32, %c0_i32_0 : i32, i32
  }
  func.func @transform_6(%arg0: i32) -> (i32, i32) {
    %c0_i32 = arith.constant 0 : i32
    %c0_i32_0 = arith.constant 0 : i32
    %c0_i32_1 = arith.constant 0 : i32
    return %c0_i32, %c0_i32_0 : i32, i32
  }
  func.func @transform_7(%arg0: i32) -> (i32, i32) {
    %c0_i32 = arith.constant 0 : i32
    %c0_i32_0 = arith.constant 0 : i32
    %c0_i32_1 = arith.constant 0 : i32
    return %c0_i32, %c0_i32_0 : i32, i32
  }
  func.func @transform_8(%arg0: i32) -> (i32, i32) {
    %c0_i32 = arith.constant 0 : i32
    %c0_i32_0 = arith.constant 0 : i32
    %c0_i32_1 = arith.constant 0 : i32
    return %c0_i32, %c0_i32_0 : i32, i32
  }
  func.func @transform_9(%arg0: i32) -> (i32, i32) {
    %c0_i32 = arith.constant 0 : i32
    %c0_i32_0 = arith.constant 0 : i32
    %c0_i32_1 = arith.constant 0 : i32
    return %c0_i32, %c0_i32_0 : i32, i32
  }
  func.func @transform_10(%arg0: i32) -> (i32, i32) {
    %c0_i32 = arith.constant 0 : i32
    %c0_i32_0 = arith.constant 0 : i32
    %c0_i32_1 = arith.constant 0 : i32
    return %c0_i32, %c0_i32_0 : i32, i32
  }
  func.func @transform_11(%arg0: i32) -> (i32, i32, i32) {
    %c0_i32 = arith.constant 0 : i32
    %c0_i32_0 = arith.constant 0 : i32
    %c0_i32_1 = arith.constant 0 : i32
    return %arg0, %c0_i32, %c0_i32_0 : i32, i32, i32
  }
}

module attributes {stable_mosaic.version = 11 : i64} {
  func.func @_ca_kernel(%arg0: i32, %arg1: memref<2x16x256xf32, #tpu.memory_space<vmem>>, %arg2: memref<8x16xbf16, #tpu.memory_space<vmem>>, %arg3: memref<8x1xf32, #tpu.memory_space<vmem>>, %arg4: memref<16x8xbf16, #tpu.memory_space<vmem>>, %arg5: memref<16x1xf32, #tpu.memory_space<vmem>>, %arg6: memref<16x8xbf16, #tpu.memory_space<vmem>>, %arg7: memref<16x1xf32, #tpu.memory_space<vmem>>, %arg8: memref<256x32xbf16, #tpu.memory_space<vmem>>, %arg9: memref<1x32xf32, #tpu.memory_space<vmem>>, %arg10: memref<16x256xbf16, #tpu.memory_space<vmem>>, %arg11: memref<16x256xbf16, #tpu.memory_space<vmem>>, %arg12: memref<2x16x256xf32, #tpu.memory_space<vmem>>) attributes {dimension_semantics = [#tpu.dimension_semantics<parallel>], iteration_bounds = array<i64: 2>, scalar_prefetch = 0 : i64, scratch_operands = 0 : i64, tpu.core_type = #tpu.core_type<tc>, window_params = [{transform_indices = @transform_0, window_bounds = array<i64: 2, 16, 256>}, {pipeline_mode = #tpu.pipeline_mode<synchronous>, transform_indices = @transform_1, window_bounds = array<i64: 8, 16>}, {pipeline_mode = #tpu.pipeline_mode<synchronous>, transform_indices = @transform_2, window_bounds = array<i64: 8, 1>}, {pipeline_mode = #tpu.pipeline_mode<synchronous>, transform_indices = @transform_3, window_bounds = array<i64: 16, 8>}, {pipeline_mode = #tpu.pipeline_mode<synchronous>, transform_indices = @transform_4, window_bounds = array<i64: 16, 1>}, {pipeline_mode = #tpu.pipeline_mode<synchronous>, transform_indices = @transform_5, window_bounds = array<i64: 16, 8>}, {pipeline_mode = #tpu.pipeline_mode<synchronous>, transform_indices = @transform_6, window_bounds = array<i64: 16, 1>}, {pipeline_mode = #tpu.pipeline_mode<synchronous>, transform_indices = @transform_7, window_bounds = array<i64: 256, 32>}, {pipeline_mode = #tpu.pipeline_mode<synchronous>, transform_indices = @transform_8, window_bounds = array<i64: 1, 32>}, {pipeline_mode = #tpu.pipeline_mode<synchronous>, transform_indices = @transform_9, window_bounds = array<i64: 16, 256>}, {pipeline_mode = #tpu.pipeline_mode<synchronous>, transform_indices = @transform_10, window_bounds = array<i64: 16, 256>}, {transform_indices = @transform_11, window_bounds = array<i64: 2, 16, 256>}]} {
    %c0 = arith.constant 0 : index
    %c0_0 = arith.constant 0 : index
    %c0_1 = arith.constant 0 : index
    %0 = vector.load %arg1[%c0, %c0_0, %c0_1] : memref<2x16x256xf32, #tpu.memory_space<vmem>>, vector<2x16x256xf32>
    %1 = vector.shape_cast %0 : vector<2x16x256xf32> to vector<32x256xf32>
    %2 = arith.truncf %1 : vector<32x256xf32> to vector<32x256xbf16>
    %c0_2 = arith.constant 0 : index
    %c0_3 = arith.constant 0 : index
    %3 = vector.load %arg8[%c0_2, %c0_3] : memref<256x32xbf16, #tpu.memory_space<vmem>>, vector<256x32xbf16>
    %cst = arith.constant dense<0.000000e+00> : vector<32x32xf32>
    %4 = tpu.matmul %2, %3, %cst {dimension_numbers = #tpu.dot_dimension_numbers<[1], [0], [0], [1], [0, 0, 1, 1], [], []>} : vector<32x256xbf16>, vector<256x32xbf16>, vector<32x32xf32> -> vector<32x32xf32>
    %5 = vector.shape_cast %4 : vector<32x32xf32> to vector<2x16x32xf32>
    %6 = arith.truncf %5 : vector<2x16x32xf32> to vector<2x16x32xbf16>
    %c0_4 = arith.constant 0 : index
    %c0_5 = arith.constant 0 : index
    %7 = vector.load %arg2[%c0_4, %c0_5] : memref<8x16xbf16, #tpu.memory_space<vmem>>, vector<8x16xbf16>
    %8 = vector.shape_cast %7 : vector<8x16xbf16> to vector<1x8x16xbf16>
    %9 = vector.broadcast %8 : vector<1x8x16xbf16> to vector<2x8x16xbf16>
    %cst_6 = arith.constant dense<0.000000e+00> : vector<2x8x32xf32>
    %10 = tpu.matmul %9, %6, %cst_6 {dimension_numbers = #tpu.dot_dimension_numbers<[2], [1], [1], [2], [0, 0, 0, 1, 1, 2], [0], [0]>} : vector<2x8x16xbf16>, vector<2x16x32xbf16>, vector<2x8x32xf32> -> vector<2x8x32xf32>
    %c0_7 = arith.constant 0 : index
    %c0_8 = arith.constant 0 : index
    %11 = vector.load %arg9[%c0_7, %c0_8] : memref<1x32xf32, #tpu.memory_space<vmem>>, vector<1x32xf32>
    %12 = vector.shape_cast %11 : vector<1x32xf32> to vector<1x1x32xf32>
    %13 = vector.broadcast %12 : vector<1x1x32xf32> to vector<2x8x32xf32>
    %14 = arith.mulf %10, %13 : vector<2x8x32xf32>
    %c0_9 = arith.constant 0 : index
    %c0_10 = arith.constant 0 : index
    %15 = vector.load %arg3[%c0_9, %c0_10] : memref<8x1xf32, #tpu.memory_space<vmem>>, vector<8x1xf32>
    %16 = vector.shape_cast %15 : vector<8x1xf32> to vector<1x8x1xf32>
    %17 = vector.broadcast %16 : vector<1x8x1xf32> to vector<2x8x32xf32>
    %18 = arith.addf %14, %17 : vector<2x8x32xf32>
    %cst_11 = arith.constant 3.000000e+00 : f32
    %19 = vector.broadcast %cst_11 : f32 to vector<2x8x32xf32>
    %20 = arith.addf %18, %19 : vector<2x8x32xf32>
    %cst_12 = arith.constant 0.000000e+00 : f32
    %cst_13 = arith.constant 6.000000e+00 : f32
    %21 = vector.broadcast %cst_12 : f32 to vector<2x8x32xf32>
    %22 = arith.maximumf %21, %20 : vector<2x8x32xf32>
    %23 = vector.broadcast %cst_13 : f32 to vector<2x8x32xf32>
    %24 = arith.minimumf %23, %22 : vector<2x8x32xf32>
    %25 = arith.mulf %18, %24 : vector<2x8x32xf32>
    %cst_14 = arith.constant 0.166666672 : f32
    %26 = vector.broadcast %cst_14 : f32 to vector<2x8x32xf32>
    %27 = arith.mulf %25, %26 : vector<2x8x32xf32>
    %28 = arith.truncf %27 : vector<2x8x32xf32> to vector<2x8x32xbf16>
    %29 = vector.extract_strided_slice %28 {offsets = [0, 0, 0], sizes = [2, 8, 16], strides = [1, 1, 1]} : vector<2x8x32xbf16> to vector<2x8x16xbf16>
    %30 = vector.extract_strided_slice %28 {offsets = [0, 0, 16], sizes = [2, 8, 16], strides = [1, 1, 1]} : vector<2x8x32xbf16> to vector<2x8x16xbf16>
    %c0_15 = arith.constant 0 : index
    %c0_16 = arith.constant 0 : index
    %31 = vector.load %arg4[%c0_15, %c0_16] : memref<16x8xbf16, #tpu.memory_space<vmem>>, vector<16x8xbf16>
    %32 = vector.shape_cast %31 : vector<16x8xbf16> to vector<1x16x8xbf16>
    %33 = vector.broadcast %32 : vector<1x16x8xbf16> to vector<2x16x8xbf16>
    %c0_17 = arith.constant 0 : index
    %c0_18 = arith.constant 0 : index
    %34 = vector.load %arg6[%c0_17, %c0_18] : memref<16x8xbf16, #tpu.memory_space<vmem>>, vector<16x8xbf16>
    %35 = vector.shape_cast %34 : vector<16x8xbf16> to vector<1x16x8xbf16>
    %36 = vector.broadcast %35 : vector<1x16x8xbf16> to vector<2x16x8xbf16>
    %cst_19 = arith.constant dense<0.000000e+00> : vector<2x16x16xf32>
    %37 = tpu.matmul %33, %29, %cst_19 {dimension_numbers = #tpu.dot_dimension_numbers<[2], [1], [1], [2], [0, 0, 0, 1, 1, 2], [0], [0]>} : vector<2x16x8xbf16>, vector<2x8x16xbf16>, vector<2x16x16xf32> -> vector<2x16x16xf32>
    %c0_20 = arith.constant 0 : index
    %c0_21 = arith.constant 0 : index
    %38 = vector.load %arg5[%c0_20, %c0_21] : memref<16x1xf32, #tpu.memory_space<vmem>>, vector<16x1xf32>
    %39 = vector.shape_cast %38 : vector<16x1xf32> to vector<1x16x1xf32>
    %40 = vector.broadcast %39 : vector<1x16x1xf32> to vector<2x16x16xf32>
    %41 = arith.addf %37, %40 : vector<2x16x16xf32>
    %42 = arith.negf %41 : vector<2x16x16xf32>
    %43 = math.exp %42 : vector<2x16x16xf32>
    %cst_22 = arith.constant 1.000000e+00 : f32
    %44 = vector.broadcast %cst_22 : f32 to vector<2x16x16xf32>
    %45 = arith.addf %44, %43 : vector<2x16x16xf32>
    %46 = arith.divf %44, %45 : vector<2x16x16xf32>
    %cst_23 = arith.constant dense<0.000000e+00> : vector<2x16x16xf32>
    %47 = tpu.matmul %36, %30, %cst_23 {dimension_numbers = #tpu.dot_dimension_numbers<[2], [1], [1], [2], [0, 0, 0, 1, 1, 2], [0], [0]>} : vector<2x16x8xbf16>, vector<2x8x16xbf16>, vector<2x16x16xf32> -> vector<2x16x16xf32>
    %c0_24 = arith.constant 0 : index
    %c0_25 = arith.constant 0 : index
    %48 = vector.load %arg7[%c0_24, %c0_25] : memref<16x1xf32, #tpu.memory_space<vmem>>, vector<16x1xf32>
    %49 = vector.shape_cast %48 : vector<16x1xf32> to vector<1x16x1xf32>
    %50 = vector.broadcast %49 : vector<1x16x1xf32> to vector<2x16x16xf32>
    %51 = arith.addf %47, %50 : vector<2x16x16xf32>
    %52 = arith.negf %51 : vector<2x16x16xf32>
    %53 = math.exp %52 : vector<2x16x16xf32>
    %cst_26 = arith.constant 1.000000e+00 : f32
    %54 = vector.broadcast %cst_26 : f32 to vector<2x16x16xf32>
    %55 = arith.addf %54, %53 : vector<2x16x16xf32>
    %56 = arith.divf %54, %55 : vector<2x16x16xf32>
    %57 = arith.truncf %46 : vector<2x16x16xf32> to vector<2x16x16xbf16>
    %58 = vector.shape_cast %57 : vector<2x16x16xbf16> to vector<32x16xbf16>
    %c0_27 = arith.constant 0 : index
    %c0_28 = arith.constant 0 : index
    %59 = vector.load %arg10[%c0_27, %c0_28] : memref<16x256xbf16, #tpu.memory_space<vmem>>, vector<16x256xbf16>
    %cst_29 = arith.constant dense<0.000000e+00> : vector<32x256xf32>
    %60 = tpu.matmul %58, %59, %cst_29 {dimension_numbers = #tpu.dot_dimension_numbers<[1], [0], [0], [1], [0, 0, 1, 1], [], []>} : vector<32x16xbf16>, vector<16x256xbf16>, vector<32x256xf32> -> vector<32x256xf32>
    %61 = arith.truncf %56 : vector<2x16x16xf32> to vector<2x16x16xbf16>
    %62 = vector.shape_cast %61 : vector<2x16x16xbf16> to vector<32x16xbf16>
    %c0_30 = arith.constant 0 : index
    %c0_31 = arith.constant 0 : index
    %63 = vector.load %arg11[%c0_30, %c0_31] : memref<16x256xbf16, #tpu.memory_space<vmem>>, vector<16x256xbf16>
    %cst_32 = arith.constant dense<0.000000e+00> : vector<32x256xf32>
    %64 = tpu.matmul %62, %63, %cst_32 {dimension_numbers = #tpu.dot_dimension_numbers<[1], [0], [0], [1], [0, 0, 1, 1], [], []>} : vector<32x16xbf16>, vector<16x256xbf16>, vector<32x256xf32> -> vector<32x256xf32>
    %65 = arith.mulf %1, %60 : vector<32x256xf32>
    %66 = arith.mulf %65, %64 : vector<32x256xf32>
    %67 = vector.shape_cast %66 : vector<32x256xf32> to vector<2x16x256xf32>
    %c0_33 = arith.constant 0 : index
    %c0_34 = arith.constant 0 : index
    %c0_35 = arith.constant 0 : index
    %68 = vector.load %arg12[%c0_33, %c0_34, %c0_35] : memref<2x16x256xf32, #tpu.memory_space<vmem>>, vector<2x16x256xf32>
    tpu.vector_store %arg12[%c0_33, %c0_34, %c0_35], %67 {strides = array<i32>} : memref<2x16x256xf32, #tpu.memory_space<vmem>>, vector<2x16x256xf32>,
    return
  }
  func.func @transform_0(%arg0: i32) -> (i32, i32, i32) {
    %c0_i32 = arith.constant 0 : i32
    %c0_i32_0 = arith.constant 0 : i32
    %c0_i32_1 = arith.constant 0 : i32
    return %arg0, %c0_i32, %c0_i32_0 : i32, i32, i32
  }
  func.func @transform_1(%arg0: i32) -> (i32, i32) {
    %c0_i32 = arith.constant 0 : i32
    %c0_i32_0 = arith.constant 0 : i32
    %c0_i32_1 = arith.constant 0 : i32
    return %c0_i32, %c0_i32_0 : i32, i32
  }
  func.func @transform_2(%arg0: i32) -> (i32, i32) {
    %c0_i32 = arith.constant 0 : i32
    %c0_i32_0 = arith.constant 0 : i32
    %c0_i32_1 = arith.constant 0 : i32
    return %c0_i32, %c0_i32_0 : i32, i32
  }
  func.func @transform_3(%arg0: i32) -> (i32, i32) {
    %c0_i32 = arith.constant 0 : i32
    %c0_i32_0 = arith.constant 0 : i32
    %c0_i32_1 = arith.constant 0 : i32
    return %c0_i32, %c0_i32_0 : i32, i32
  }
  func.func @transform_4(%arg0: i32) -> (i32, i32) {
    %c0_i32 = arith.constant 0 : i32
    %c0_i32_0 = arith.constant 0 : i32
    %c0_i32_1 = arith.constant 0 : i32
    return %c0_i32, %c0_i32_0 : i32, i32
  }
  func.func @transform_5(%arg0: i32) -> (i32, i32) {
    %c0_i32 = arith.constant 0 : i32
    %c0_i32_0 = arith.constant 0 : i32
    %c0_i32_1 = arith.constant 0 : i32
    return %c0_i32, %c0_i32_0 : i32, i32
  }
  func.func @transform_6(%arg0: i32) -> (i32, i32) {
    %c0_i32 = arith.constant 0 : i32
    %c0_i32_0 = arith.constant 0 : i32
    %c0_i32_1 = arith.constant 0 : i32
    return %c0_i32, %c0_i32_0 : i32, i32
  }
  func.func @transform_7(%arg0: i32) -> (i32, i32) {
    %c0_i32 = arith.constant 0 : i32
    %c0_i32_0 = arith.constant 0 : i32
    %c0_i32_1 = arith.constant 0 : i32
    return %c0_i32, %c0_i32_0 : i32, i32
  }
  func.func @transform_8(%arg0: i32) -> (i32, i32) {
    %c0_i32 = arith.constant 0 : i32
    %c0_i32_0 = arith.constant 0 : i32
    %c0_i32_1 = arith.constant 0 : i32
    return %c0_i32, %c0_i32_0 : i32, i32
  }
  func.func @transform_9(%arg0: i32) -> (i32, i32) {
    %c0_i32 = arith.constant 0 : i32
    %c0_i32_0 = arith.constant 0 : i32
    %c0_i32_1 = arith.constant 0 : i32
    return %c0_i32, %c0_i32_0 : i32, i32
  }
  func.func @transform_10(%arg0: i32) -> (i32, i32) {
    %c0_i32 = arith.constant 0 : i32
    %c0_i32_0 = arith.constant 0 : i32
    %c0_i32_1 = arith.constant 0 : i32
    return %c0_i32, %c0_i32_0 : i32, i32
  }
  func.func @transform_11(%arg0: i32) -> (i32, i32, i32) {
    %c0_i32 = arith.constant 0 : i32
    %c0_i32_0 = arith.constant 0 : i32
    %c0_i32_1 = arith.constant 0 : i32
    return %arg0, %c0_i32, %c0_i32_0 : i32, i32, i32
  }
}

</mosaic_0001>

<bundles_post_ra>
// kernel: tpu_custom_call.1
= control target key start
LH: loop header
LB: loop body
LE: loop exit
PB: predicated region body
PF: predicated region fallthrough
CT: control target
= control target key end

     0   :  { %16 = vsyncpa [#allocation3], 0  ;;  %s1851_s0 = inlined_call_operand.vmem [shape: f32[4,16,256], index: 0, kind: input, shape index: {}]   ;;  %s1852_s1 = inlined_call_operand.vmem [shape: bf16[8,16], index: 1, kind: input, shape index: {}]   ;;  %s1853_s2 = inlined_call_operand.vmem [shape: f32[8,1], index: 2, kind: input, shape index: {}]   ;;  %s1854_s3 = inlined_call_operand.vmem [shape: bf16[16,8], index: 3, kind: input, shape index: {}]   ;;  %s1855_s4 = inlined_call_operand.vmem [shape: f32[16,1], index: 4, kind: input, shape index: {}]   ;;  %s1856_s5 = inlined_call_operand.vmem [shape: bf16[16,8], index: 5, kind: input, shape index: {}]   ;;  %s1857_s6 = inlined_call_operand.vmem [shape: f32[16,1], index: 6, kind: input, shape index: {}]   ;;  %s1858_s7 = inlined_call_operand.vmem [shape: bf16[256,32], index: 7, kind: input, shape index: {}]   ;;  %s1859_s8 = inlined_call_operand.vmem [shape: f32[1,32], index: 8, kind: input, shape index: {}]   ;;  %s1860_s9 = inlined_call_operand.vmem [shape: bf16[16,256], index: 9, kind: input, shape index: {}]   ;;  %s1861_s10 = inlined_call_operand.vmem [shape: bf16[16,256], index: 10, kind: input, shape index: {}]   ;;  %s1862_s11 = inlined_call_operand.hbm [shape: f32[4,16,256], index: 11, kind: output, shape index: {}]  }
   0x1   :  { %18 = vsyncpa [#allocation3 + $0x1], 0  ;;  %s1588_s17 = smov 0   ;;  %s1590_s18 = smov 0  }
   0x2   :  { %s1592_s19 = smov 0   ;;  %s1594_s20 = smov 0  }
   0x3 LB: > { %1866 = sst [smem:[#allocation5_spill]] %s1515_s19  ;;  %s1609_s21 = sadd.s32 4294967295, %s1519_s20   ;;  %s1519_s20 = sphi %s1594_s20, %s1871_s20   ;;  %s1515_s19 = sphi %s1592_s19, %s1873_s19   ;;  %s1511_s18 = sphi %s1590_s18, %s1875_s18   ;;  %s1507_s17 = sphi %s1588_s17, %s1874_s17  }
   0x4   : > { %s1220_s22 = sadd.s32 4294967294, %s1519_s20   ;;  %s1613_s23 = sadd.s32 1, %s1519_s20  }
   0x5   : > { %1867 = sst [smem:[#allocation6_spill]] %s1613_s23  ;;  %s267_s24 = sadd.s32 1, %s1515_s19 }
   0x6   : > { %s264_s25 = ssub.s32 %s1519_s20, %s1613_s23  ;;  %p277_p0 = scmp.ne.s32.totalorder %s1515_s19, %s1511_s18 }
   0x7   : > { %p265_p1 = scmp.eq.s32.totalorder %s264_s25, 0  ;;  %p278_p2 = scmp.eq.s32.totalorder %s1609_s21, 1 }
   0x8   : > { %p283_p3 = scmp.ne.s32.totalorder %s1511_s18, %s1507_s17  ;;  %p284_p4 = scmp.eq.s32.totalorder %s1220_s22, 1 }
   0x9   : > { %s1624_s26 = scalar_select %p265_p1, %s1515_s19, %s267_s24  }
   0xa   : > { %p1626_p5 = por %p278_p2, %p277_p0  ;;  %p1630_p6 = por %p284_p4, %p283_p3 }
   0xb   : > { %1868 = sst [smem:[#allocation7_spill]] %s1624_s26  ;;  %p1223_p7 = scmp.ge.s32.totalorder %s1519_s20, 1 }
   0xc   : > { %p342_p8 = scmp.lt.s32.totalorder %s1519_s20, 3 }
   0xe   : > { %p343_p9 = pnand %p1223_p7, %p342_p8 }
   0xf   : > { %v1401_v0 = vld [vmem:[%s1858_s7 + $0x40] sm:$0xff] (!%p343_p9)   ;;  %s1225_s12 = sshll.u32 (!%p343_p9), %s1609_s21, 1  ;;  %v1403_v2 = vld [vmem:[%s1858_s7 + $0x48] sm:$0xff] (!%p343_p9)   ;;  %v1405_v4 = vld [vmem:[%s1858_s7 + $0x50] sm:$0xff] (!%p343_p9)   ;;  %v1521_v28 = vmov (!%p343_p9), 0.0   ;;  %vm1522_vm0 = vmmov (!%p343_p9), 0  }
  0x10   : > { %346 = sbr.rel (%p343_p9) target bundleno = 1101 (0x44d), region = 64  ;;  %v1402_v1 = vld [vmem:[%s1858_s7] sm:$0xff] (!%p343_p9)   ;;  %1278 = vmatprep.subr.bf16.mxu0 (!%p343_p9), %v1401_v0  ;;  %p384_p10 = scmp.lt.s32.totalorder (!%p343_p9), %s1225_s12, 3  ;;  %v1404_v3 = vld [vmem:[%s1858_s7 + $0x8] sm:$0xff] (!%p343_p9)   ;;  %v1406_v5 = vld [vmem:[%s1858_s7 + $0x10] sm:$0xff] (!%p343_p9)   ;;  %1318 = vmatprep.subr.bf16.mxu1 (!%p343_p9), %v1521_v28  ;;  %v1523_v30 = vmov (!%p343_p9), 0  }
  0x11   : > { %1279 = vmatpush3.bf16.msra.mxu0 (!%p343_p9), %v1402_v1  ;;  %v1407_v6 = vld [vmem:[%s1858_s7 + $0x58] sm:$0xff] (!%p343_p9)   ;;  %v1409_v8 = vld [vmem:[%s1858_s7 + $0x60] sm:$0xff] (!%p343_p9)   ;;  %v1411_v10 = vld [vmem:[%s1858_s7 + $0x68] sm:$0xff] (!%p343_p9)   ;;  %1320 = vmatprep.mubr.msk.bf16.mxu1 (!%p343_p9), %vm1522_vm0, %v1521_v28  ;;  %vm584_vm1 = vcmask (!%p343_p9), 130048   ;;  %vm722_vm2 = vcmask (!%p343_p9), 1043456   ;;  %vm718_vm3 = vcmask (!%p343_p9), 64512  }
  0x12   : > { %1280 = vmatprep.subr.bf16.mxu0 (!%p343_p9), %v1403_v2  ;;  %v1408_v7 = vld [vmem:[%s1858_s7 + $0x18] sm:$0xff] (!%p343_p9)   ;;  %v1410_v9 = vld [vmem:[%s1858_s7 + $0x20] sm:$0xff] (!%p343_p9)   ;;  %v1412_v14 = vld [vmem:[%s1858_s7 + $0x28] sm:$0xff] (!%p343_p9)   ;;  %1399 = vset.pattern.permute.xlu0 (!%p343_p9), %v1523_v30  ;;  %s380_s14 = sand.u32 (!%p343_p9), 1, %s1511_s18   ;;  %s1277_s19 = sshll.u32 (!%p343_p9), %s1609_s21, 10 }
  0x13   : > { %v1413_v15 = vld [vmem:[%s1858_s7 + $0x70] sm:$0xff] (!%p343_p9)   ;;  %v1415_v17 = vld [vmem:[%s1858_s7 + $0x78] sm:$0xff] (!%p343_p9)   ;;  %v677_v29 = vld [vmem:[%s1853_s2] sm:$0xff] (!%p343_p9)  ;;  %1400 = vset.pattern.permute.xlu1 (!%p343_p9), %v1523_v30  ;;  %s1804_s22 = scalar_lea.hbm (!%p343_p9), %s1862_s11, %s1277_s19  ;;  %s1810_s21 = scalar_lea.sflag (!%p343_p9), [#allocation3], %s380_s14 }
  0x14   : > { %v1414_v16 = vld [vmem:[%s1858_s7 + $0x30] sm:$0xff] (!%p343_p9)   ;;  %v1416_v18 = vld [vmem:[%s1858_s7 + $0x38] sm:$0xff] (!%p343_p9)   ;;  %680 = vperm.xlu0 (!%p343_p9), %1399, %v677_v29   ;;  %v583_v39 = vld [vmem:[%s1852_s1] sm:$0xf] (!%p343_p9)  ;;  %s1525_s25 = smov (!%p343_p9), [#allocation2]  }
  0x15   : > { %1281 = vmatpush3.bf16.msra.mxu0 (!%p343_p9), %v1404_v3  ;;  %v1246_v46 = vld [vmem:[%s1859_s8] ss:$0 sm:$0xff] (!%p343_p9)  ;;  %s1461_s29 = sshll.u32 (!%p343_p9), %s1525_s25, 4  ;;  %s1462_s29 = int_to_ptr.vmem [resolvable:$false] %s1461_s29 }
  0x16   : > { %1282 = vmatprep.subr.bf16.mxu0 (!%p343_p9), %v1405_v4  ;;  %s1463_s13 = scalar_lea.vmem (!%p343_p9), %s1462_s29, 2048 }
  0x17   : > { %s1877_s12 = smov (!%p384_p10, %s1225_s12), 3 }
  0x18   : > { %s1275_s16 = sshll.u32 %s1877_s12, 5 }
  0x19   : > { %1283 = vmatpush3.bf16.msra.mxu0 %v1406_v5  ;;  %s388_s30 = scalar_lea.vmem %s1851_s0, %s1275_s16  ;;  %s1524_s16 = smov 112   ;;  %v1417_v5 = vld [vmem:[%s1854_s3] sm:$0xff]  }
  0x1a   : > { %1284 = vmatprep.subr.bf16.mxu0 %v1407_v6  ;;  %v1673_v11 = vld [vmem:[%s388_s30 + $0x8] sm:$0xff]  ;;  %v1675_v12 = vld [vmem:[%s388_s30 + $0x18] sm:$0xff]  ;;  %v1694_v19 = vld [vmem:[%s388_s30] sm:$0xff] }
  0x1b   : > { %v401_v13 = vpack.c.bf16 %v1675_v12, %v1673_v11  ;;  %v1696_v20 = vld [vmem:[%s388_s30 + $0x10] sm:$0xff]  ;;  %v1698_v21 = vld [vmem:[%s388_s30 + $0x28] sm:$0xff]  ;;  %v1700_v22 = vld [vmem:[%s388_s30 + $0x38] sm:$0xff] }
  0x1c   : > { %v400_v23 = vpack.c.bf16 %v1696_v20, %v1694_v19  ;;  %v403_v24 = vpack.c.bf16 %v1700_v22, %v1698_v21  ;;  %v1706_v25 = vld [vmem:[%s388_s30 + $0x20] sm:$0xff]  ;;  %v1708_v26 = vld [vmem:[%s388_s30 + $0x30] sm:$0xff]  ;;  %s1224_s30 = sshll.u32 %s380_s14, 6 }
  0x1d   : > { %1285 = vmatpush3.bf16.msra.mxu0 %v1408_v7  ;;  %564 = vmatprep.mubr.bf16.mxu0 %v401_v13  ;;  %v402_v27 = vpack.c.bf16 %v1708_v26, %v1706_v25  ;;  %v702_v7 = vld [vmem:[%s1855_s4 + $0x8] sm:$0xff]  ;;  %s382_s15 = scalar_lea.vmem [#allocation2], %s1224_s30 }
  0x1e   : > { %1286 = vmatprep.subr.bf16.mxu0 %v1409_v8  ;;  %s1158_s26 = sshll.u32 %s382_s15, 4  ;;  %s1806_s26 = int_to_ptr.vmem [resolvable:$true] %s1158_s26 }
  0x1f   : > { %s1457_s24 = scalar_lea.vmem %s1806_s26, 1024  ;;  %p1464_p0 = scmp.lt.s32.totalorder %s1806_s26, %s1462_s29 }
  0x20   : > { %p1458_p11 = scmp.ne.s32.totalorder %s1806_s26, %s1457_s24  ;;  %p1465_p1 = scmp.lt.s32.totalorder %s1463_s13, %s1457_s24 }
  0x21   : > { %1287 = vmatpush3.bf16.msra.mxu0 %v1410_v9 }
  0x22   : > { %1288 = vmatprep.subr.bf16.mxu0 %v1411_v10  ;;  %v836_v10 = vld [vmem:[%s1857_s6 + $0x8] sm:$0xff]  ;;  %p1459_p12 = pnand %p1458_p11, %p1626_p5  ;;  %p1466_p2 = por %p1465_p1, %p1464_p0 }
  0x24   : > { %p1460_p13 = pneg %p1459_p12 }
  0x25   : > { %1289 = vmatpush3.bf16.msra.mxu0 %v1412_v14 }
  0x26   : > { %1290 = vmatprep.subr.bf16.mxu0 %v1413_v15  ;;  %v701_v15 = vld [vmem:[%s1855_s4] sm:$0xff]  ;;  %p1467_p3 = pnand %p1466_p2, %p1460_p13 }
  0x29   : > { %1291 = vmatpush3.bf16.msra.mxu0 %v1414_v16  ;;  %v835_v16 = vld [vmem:[%s1857_s6] sm:$0xff] }
  0x2a   : > { %1292 = vmatprep.subr.bf16.mxu0 %v1415_v17 }
  0x2d   : > { %1293 = vmatpush3.bf16.msra.mxu0 %v1416_v18  ;;  %v1421_v18 = vld [vmem:[%s1860_s9 + $0x4] ss:$8 sps:$4 sm:$0xff]  }
  0x2e   : > { %993 = vmatprep.subr.bf16.mxu0 %v1421_v18 }
  0x30   : > { %565 = vmatmul.mubr.bf16.vlgmr.msra.gmra.mrb[0].mxu0 %v400_v23 }
  0x31   : > { %572 = vmatprep.mubr.bf16.mxu0 %v403_v24  ;;  %v1418_v24 = vld [vmem:[%s1856_s5] sm:$0xff]  }
  0x38   : > { %573 = vmatmul.mubr.bf16.gmra.mrb[4].mxu0 %v402_v27  ;;  %v1419_v27 = vld [vmem:[%s1860_s9] ss:$8 sps:$4 sm:$0xff]  }
  0x39   : > { %1025 = vmatprep.mubr.bf16.mxu0 %v1523_v30  ;;  %994 = vmatpush1.bf16.msra.mxu0 %v1419_v27 }
  0x93   : > { %v681_v48 = vpop.permute.xlu0 %680 }
 0x103   : > { %v1294_v31 = vpop.f32.mrb[0].mxu0 }
 0x104   : > { %v1295_v32 = vpop.f32.mrb[1].mxu0 }
 0x105   : > { %v1296_v33 = vadd.f32 %v1295_v32, %v1294_v31  ;;  %v1297_v34 = vpop.f32.mrb[2].mxu0 }
 0x106   : > { %v1298_v35 = vpop.f32.mrb[3].mxu0 }
 0x107   : > { %v1299_v36 = vadd.f32 %v1298_v35, %v1297_v34 }
 0x109   : > { %v581_v37 = vpack.c.bf16 %v1299_v36, %v1296_v33 }
 0x10b   : > { %v1300_v38 = vpop.f32.mrb[4].mxu0  ;;  %1319 = vmatpush3.bf16.msra.mxu1 %v581_v37 }
 0x10c   : > { %v1301_v40 = vpop.f32.mrb[5].mxu0  ;;  %1324 = vmatprep.subr.bf16.mxu1 %v1521_v28 }
 0x10d   : > { %v1302_v41 = vadd.f32 %v1301_v40, %v1300_v38  ;;  %v1303_v42 = vpop.f32.mrb[6].mxu0 }
 0x10e   : > { %v1304_v43 = vpop.f32.mrb[7].mxu0  ;;  %1321 = vmatmul.mubr.msk.bf16.vlgmr.msra.gmra.mrb[0].mxu1 %vm584_vm1, %v583_v39 }
 0x10f   : > { %v1305_v44 = vadd.f32 %v1304_v43, %v1303_v42  ;;  %1326 = vmatprep.mubr.msk.bf16.mxu1 %vm1522_vm0, %v1521_v28 }
 0x111   : > { %v582_v45 = vpack.c.bf16 %v1305_v44, %v1302_v41 }
 0x113   : > { %1325 = vmatpush3.bf16.msra.mxu1 %v582_v45 }
 0x114   : > { %1330 = vmatprep.subr.bf16.mxu1 %v1521_v28 }
 0x116   : > { %1327 = vmatmul.mubr.msk.bf16.vlgmr.msra.gmra.mrb[4].mxu1 %vm584_vm1, %v583_v39 }
 0x117   : > { %1332 = vmatprep.mubr.msk.bf16.mxu1 %vm1522_vm0, %v1521_v28 }
 0x1e1   : > { %v622_v47 = vpop.f32.mrb[0].mxu1 }
 0x1e2   : > { %v675_v49 = vmul.f32 %v1246_v46, %v622_v47  ;;  %v1322_v50 = vpop.f32.mrb[1].mxu1 }
 0x1e3   : > { %v625_v51 = vpop.f32.mrb[2].mxu1 }
 0x1e4   : > { %v683_v52 = vadd.f32 %v681_v48, %v675_v49  ;;  %v1323_v53 = vpop.f32.mrb[3].mxu1  ;;  %v1424_v49 = vld [vmem:[%s1861_s10 + $0x4] ss:$8 sps:$4 sm:$0xff]   ;;  %v1422_v51 = vld [vmem:[%s1861_s10] ss:$8 sps:$4 sm:$0xff]  }
 0x1e6   : > { %v685_v54 = vadd.f32 3.0, %v683_v52 }
 0x1e8   : > { %v687_v55 = vmax.f32 %v685_v54, 0.0 }
 0x1e9   : > { %v662_v56 = vpop.f32.mrb[4].mxu1 }
 0x1ea   : > { %v689_v57 = vmin.f32 %v687_v55, 6.0  ;;  %v676_v58 = vmul.f32 %v1246_v46, %v662_v56  ;;  %v1328_v59 = vpop.f32.mrb[5].mxu1 }
 0x1eb   : > { %v665_v60 = vpop.f32.mrb[6].mxu1 }
 0x1ec   : > { %v691_v61 = vmul.f32 %v689_v57, %v683_v52  ;;  %v684_v62 = vadd.f32 %v681_v48, %v676_v58  ;;  %v1329_v63 = vpop.f32.mrb[7].mxu1 }
 0x1ee   : > { %v693_v0 = vmul.f32 0.16666667, %v691_v61  ;;  %v686_v1 = vadd.f32 3.0, %v684_v62 }
 0x1f0   : > { %v695_v2 = vpack.c.bf16 %v693_v0, %v693_v0  ;;  %v688_v3 = vmax.f32 %v686_v1, 0.0 }
 0x1f2   : > { %853 = vrot.lane.b32.xlu0 %v695_v2, %s1524_s16  ;;  %v724_v4 = vsel %vm722_vm2, %v695_v2, 0  ;;  %v690_v6 = vmin.f32 %v688_v3, 6.0 }
 0x1f3   : > { %1331 = vmatpush3.bf16.msra.mxu1 %v724_v4 }
 0x1f4   : > { %1336 = vmatprep.subr.bf16.mxu1 %v1521_v28  ;;  %v692_v8 = vmul.f32 %v690_v6, %v684_v62 }
 0x1f6   : > { %710 = vperm.xlu0 %1399, %v702_v7   ;;  %1333 = vmatmul.mubr.msk.bf16.vlgmr.msra.gmra.mrb[8].mxu1 %vm718_vm3, %v1417_v5  ;;  %v694_v9 = vmul.f32 0.16666667, %v692_v8 }
 0x1f7   : > { %1338 = vmatprep.mubr.msk.bf16.mxu1 %vm1522_vm0, %v1521_v28 }
 0x1f8   : > { %v696_v13 = vpack.c.bf16 %v694_v9, %v694_v9 }
 0x1fa   : > { %844 = vperm.xlu0 %1399, %v836_v10   ;;  %903 = vrot.lane.b32.xlu1 %v696_v13, %s1524_s16  ;;  %v768_v14 = vsel %vm722_vm2, %v696_v13, 0 }
 0x1fb   : > { %1337 = vmatpush3.bf16.msra.mxu1 %v768_v14 }
 0x1fc   : > { %1342 = vmatprep.subr.bf16.mxu1 %v1521_v28 }
 0x1fe   : > { %1339 = vmatmul.mubr.msk.bf16.vlgmr.msra.gmra.mrb[12].mxu1 %vm718_vm3, %v1417_v5  ;;  %705 = vperm.xlu1 %1400, %v701_v15  }
 0x1ff   : > { %1344 = vmatprep.mubr.msk.bf16.mxu1 %vm1522_vm0, %v1521_v28 }
 0x202   : > { %839 = vperm.xlu1 %1400, %v835_v16  }
 0x264   : > { %v854_v17 = vpop.permute.xlu0 %853 }
 0x265   : > { %v859_v23 = vsel %vm722_vm2, %v854_v17, 0 }
 0x266   : > { %1343 = vmatpush3.bf16.msra.mxu1 %v859_v23 }
 0x267   : > { %1348 = vmatprep.subr.bf16.mxu1 %v1521_v28 }
 0x269   : > { %1345 = vmatmul.mubr.msk.bf16.vlgmr.msra.gmra.mrb[16].mxu1 %vm718_vm3, %v1418_v24 }
 0x26a   : > { %1350 = vmatprep.mubr.msk.bf16.mxu1 %vm1522_vm0, %v1521_v28 }
 0x26c   : > { %v904_v29 = vpop.permute.xlu1 %903 }
 0x26d   : > { %v906_v31 = vsel %vm722_vm2, %v904_v29, 0 }
 0x26e   : > { %1349 = vmatpush3.bf16.msra.mxu1 %v906_v31 }
 0x26f   : > { %1066 = vmatprep.subr.bf16.mxu1 %v1424_v49 }
 0x271   : > { %1351 = vmatmul.mubr.msk.bf16.vlgmr.msra.gmra.mrb[20].mxu1 %vm718_vm3, %v1418_v24 }
 0x272   : > { %1098 = vmatprep.mubr.bf16.mxu1 %v1523_v30  ;;  %1067 = vmatpush1.bf16.msra.mxu1 %v1422_v51 }
 0x275   : > { %v711_v36 = vpop.permute.xlu0 %710 }
 0x279   : > { %v845_v5 = vpop.permute.xlu0 %844 }
 0x27d   : > { %v706_v32 = vpop.permute.xlu1 %705 }
 0x281   : > { %v840_v2 = vpop.permute.xlu1 %839 }
 0x2c9   : > { %v760_v33 = vpop.f32.mrb[8].mxu1 }
 0x2ca   : > { %v1334_v34 = vpop.f32.mrb[9].mxu1  ;;  %v761_v35 = vadd.f32 %v760_v33, %v706_v32 }
 0x2cb   : > { %v763_v37 = vpop.f32.mrb[10].mxu1 }
 0x2cc   : > { %v1250_v38 = vmul.f32 -1.442695, %v761_v35  ;;  %v764_v39 = vadd.f32 %v763_v37, %v711_v36  ;;  %v1335_v40 = vpop.f32.mrb[11].mxu1 }
 0x2ce   : > { %1425 = vpow2.f32 %v1250_v38  ;;  %v1251_v41 = vmul.f32 -1.442695, %v764_v39 }
 0x2d0   : > { %1427 = vpow2.f32 %v1251_v41 }
 0x2d1   : > { %v804_v28 = vpop.f32.mrb[12].mxu1 }
 0x2d2   : > { %v805_v42 = vadd.f32 %v804_v28, %v706_v32  ;;  %v1340_v43 = vpop.f32.mrb[13].mxu1 }
 0x2d3   : > { %v807_v44 = vpop.f32.mrb[14].mxu1 }
 0x2d4   : > { %v1252_v45 = vmul.f32 -1.442695, %v805_v42  ;;  %v808_v46 = vadd.f32 %v807_v44, %v711_v36  ;;  %v1341_v47 = vpop.f32.mrb[15].mxu1 }
 0x2d6   : > { %1429 = vpow2.f32 %v1252_v45  ;;  %v1253_v48 = vmul.f32 -1.442695, %v808_v46 }
 0x2d8   : > { %v1426_v50 = vpop.eup %1425  ;;  %1431 = vpow2.f32 %v1253_v48 }
 0x2d9   : > { %v823_v52 = vadd.f32 1.0, %v1426_v50 }
 0x2da   : > { %v1428_v53 = vpop.eup %1427 }
 0x2db   : > { %1433 = vrcp.f32 %v823_v52  ;;  %v824_v54 = vadd.f32 1.0, %v1428_v53 }
 0x2dd   : > { %1435 = vrcp.f32 %v824_v54 }
 0x2e0   : > { %v1430_v55 = vpop.eup %1429 }
 0x2e1   : > { %v825_v56 = vadd.f32 1.0, %v1430_v55 }
 0x2e2   : > { %v1432_v57 = vpop.eup %1431 }
 0x2e3   : > { %1437 = vrcp.f32 %v825_v56  ;;  %v826_v58 = vadd.f32 1.0, %v1432_v57 }
 0x2e5   : > { %v1434_v59 = vpop.eup %1433  ;;  %1439 = vrcp.f32 %v826_v58 }
 0x2e7   : > { %v1436_v60 = vpop.eup %1435 }
 0x2e8   : > { %v973_v61 = vpack.c.bf16 %v1436_v60, %v1434_v59 }
 0x2ea   : > { %1263 = vmatmul.mubr.msk.bf16.vlgmr.msra.gmra.mrb[8].mxu0 %vm584_vm1, %v973_v61 }
 0x2eb   : > { %1035 = vmatprep.mubr.bf16.mxu0 %v1523_v30 }
 0x2ed   : > { %v1438_v62 = vpop.eup %1437 }
 0x2ef   : > { %v1440_v63 = vpop.eup %1439 }
 0x2f0   : > { %v974_v0 = vpack.c.bf16 %v1440_v63, %v1438_v62 }
 0x2f2   : > { %1264 = vmatmul.mubr.msk.bf16.gmra.mrb[12].mxu0 %vm584_vm1, %v974_v0 }
 0x33c   : > { %v895_v1 = vpop.f32.mrb[16].mxu1 }
 0x33d   : > { %v1346_v3 = vpop.f32.mrb[17].mxu1  ;;  %v896_v4 = vadd.f32 %v895_v1, %v840_v2 }
 0x33e   : > { %v898_v6 = vpop.f32.mrb[18].mxu1 }
 0x33f   : > { %v1257_v7 = vmul.f32 -1.442695, %v896_v4  ;;  %v899_v8 = vadd.f32 %v898_v6, %v845_v5  ;;  %v1347_v9 = vpop.f32.mrb[19].mxu1 }
 0x341   : > { %1441 = vpow2.f32 %v1257_v7  ;;  %v1258_v10 = vmul.f32 -1.442695, %v899_v8 }
 0x343   : > { %1443 = vpow2.f32 %v1258_v10 }
 0x344   : > { %v942_v13 = vpop.f32.mrb[20].mxu1 }
 0x345   : > { %v943_v14 = vadd.f32 %v942_v13, %v840_v2  ;;  %v1352_v15 = vpop.f32.mrb[21].mxu1 }
 0x346   : > { %v945_v16 = vpop.f32.mrb[22].mxu1 }
 0x347   : > { %v1259_v17 = vmul.f32 -1.442695, %v943_v14  ;;  %v946_v18 = vadd.f32 %v945_v16, %v845_v5  ;;  %v1353_v23 = vpop.f32.mrb[23].mxu1 }
 0x349   : > { %1445 = vpow2.f32 %v1259_v17  ;;  %v1260_v24 = vmul.f32 -1.442695, %v946_v18 }
 0x34b   : > { %v1442_v27 = vpop.eup %1441  ;;  %1447 = vpow2.f32 %v1260_v24 }
 0x34c   : > { %v961_v29 = vadd.f32 1.0, %v1442_v27 }
 0x34d   : > { %v1444_v31 = vpop.eup %1443 }
 0x34e   : > { %v962_v32 = vadd.f32 1.0, %v1444_v31  ;;  %1449 = vrcp.f32 %v961_v29 }
 0x350   : > { %1451 = vrcp.f32 %v962_v32 }
 0x353   : > { %v1446_v33 = vpop.eup %1445 }
 0x354   : > { %v963_v34 = vadd.f32 1.0, %v1446_v33 }
 0x355   : > { %v1448_v35 = vpop.eup %1447 }
 0x356   : > { %v964_v36 = vadd.f32 1.0, %v1448_v35  ;;  %1453 = vrcp.f32 %v963_v34 }
 0x358   : > { %1455 = vrcp.f32 %v964_v36  ;;  %v1450_v37 = vpop.eup %1449 }
 0x35a   : > { %v1452_v38 = vpop.eup %1451 }
 0x35b   : > { %v1046_v39 = vpack.c.bf16 %v1452_v38, %v1450_v37 }
 0x35d   : > { %1267 = vmatmul.mubr.msk.bf16.vlgmr.msra.gmra.mrb[24].mxu1 %vm584_vm1, %v1046_v39 }
 0x35e   : > { %1108 = vmatprep.mubr.bf16.mxu1 %v1523_v30 }
 0x360   : > { %v1454_v40 = vpop.eup %1453 }
 0x362   : > { %v1456_v41 = vpop.eup %1455 }
 0x363   : > { %v1047_v28 = vpack.c.bf16 %v1456_v41, %v1454_v40 }
 0x365   : > { %1268 = vmatmul.mubr.msk.bf16.gmra.mrb[28].mxu1 %vm584_vm1, %v1047_v28 }
 0x3bd   : > { %v1027_v42 = vpop.f32.mrb[8].mxu0 }
 0x3be   : > { %v1029_v43 = vpop.f32.mrb[9].mxu0  ;;  %v1119_v50 = vmul.f32 %v1027_v42, %v1694_v19 }
 0x3bf   : > { %v1031_v44 = vpop.f32.mrb[10].mxu0  ;;  %v1120_v30 = vmul.f32 %v1029_v43, %v1673_v11 }
 0x3c0   : > { %v1033_v45 = vpop.f32.mrb[11].mxu0  ;;  %v1121_v52 = vmul.f32 %v1031_v44, %v1696_v20 }
 0x3c1   : > { %v1122_v55 = vmul.f32 %v1033_v45, %v1675_v12 }
 0x3c5   : > { %v1037_v46 = vpop.f32.mrb[12].mxu0 }
 0x3c6   : > { %v1039_v47 = vpop.f32.mrb[13].mxu0  ;;  %v1123_v11 = vmul.f32 %v1037_v46, %v1706_v25 }
 0x3c7   : > { %v1041_v48 = vpop.f32.mrb[14].mxu0  ;;  %v1124_v19 = vmul.f32 %v1039_v47, %v1698_v21 }
 0x3c8   : > { %v1043_v49 = vpop.f32.mrb[15].mxu0  ;;  %v1125_v12 = vmul.f32 %v1041_v48, %v1708_v26 }
 0x3c9   : > { %v1126_v63 = vmul.f32 %v1043_v49, %v1700_v22 }
 0x430   : > { %v1100_v51 = vpop.f32.mrb[24].mxu1 }
 0x431   : > { %v1127_v53 = vmul.f32 %v1119_v50, %v1100_v51  ;;  %v1102_v54 = vpop.f32.mrb[25].mxu1 }
 0x432   : > { %v1128_v56 = vmul.f32 %v1120_v30, %v1102_v54  ;;  %v1104_v57 = vpop.f32.mrb[26].mxu1 }
 0x433   : > { %1135 = vst [vmem:[%s382_s15] sm:$0xff] %v1127_v53  ;;  %v1129_v58 = vmul.f32 %v1121_v52, %v1104_v57  ;;  %v1106_v59 = vpop.f32.mrb[27].mxu1 }
 0x434   : > { %1136 = vst [vmem:[%s382_s15 + $0x8] sm:$0xff] %v1128_v56  ;;  %v1130_v60 = vmul.f32 %v1122_v55, %v1106_v59 }
 0x435   : > { %1137 = vst [vmem:[%s382_s15 + $0x10] sm:$0xff] %v1129_v58 }
 0x436   : > { %1138 = vst [vmem:[%s382_s15 + $0x18] sm:$0xff] %v1130_v60 }
 0x438   : > { %v1110_v20 = vpop.f32.mrb[28].mxu1 }
 0x439   : > { %v1131_v61 = vmul.f32 %v1123_v11, %v1110_v20  ;;  %v1112_v62 = vpop.f32.mrb[29].mxu1 }
 0x43a   : > { %v1132_v0 = vmul.f32 %v1124_v19, %v1112_v62  ;;  %v1114_v1 = vpop.f32.mrb[30].mxu1 }
 0x43b   : > { %1139 = vst [vmem:[%s382_s15 + $0x20] sm:$0xff] %v1131_v61  ;;  %v1133_v2 = vmul.f32 %v1125_v12, %v1114_v1  ;;  %v1116_v3 = vpop.f32.mrb[31].mxu1 }
 0x43c   : > { %1140 = vst [vmem:[%s382_s15 + $0x28] sm:$0xff] %v1132_v0  ;;  %v1134_v21 = vmul.f32 %v1126_v63, %v1116_v3 }
 0x43d   : > { %1141 = vst [vmem:[%s382_s15 + $0x30] sm:$0xff] %v1133_v2 }
 0x43e   : > { %1142 = vst [vmem:[%s382_s15 + $0x38] sm:$0xff] %v1134_v21 }
 0x43f   : > { %1470 = shalt.err (!%p1467_p3)
}
 0x440   : > { %s1471_s12 = scalar_lea.hbm %s1804_s22, 1024  ;;  %s1475_s15 = scalar_lea.hbm %s1862_s11, 2048 }
 0x441   : > { %p1472_p4 = scmp.ne.s32.totalorder %s1804_s22, %s1471_s12  ;;  %p1476_p9 = scmp.lt.u32.totalorder %s1804_s22, %s1862_s11 }
 0x442   : > { %p1477_p10 = scmp.lt.u32.totalorder %s1475_s15, %s1471_s12  ;;  %p1479_p12 = scmp.lt.u32.totalorder %s1471_s12, %s1804_s22 }
 0x443   : > { %p1473_p7 = pnand %p1472_p4, %p1626_p5 }
 0x444   : > { %p1478_p11 = por %p1477_p10, %p1476_p9 }
 0x445   : > { %p1474_p8 = pneg %p1473_p7 }
 0x446   : > { %p1480_p13 = por %p1479_p12, %p1478_p11 }
 0x448   : > { %p1481_p0 = pnand %p1480_p13, %p1474_p8 }
 0x44a   : > { %1484 = shalt.err (!%p1481_p0)
}
 0x44b   : > { %s1526_s23 = smov 256   ;;  %s1527_s24 = smov 16  }
 0x44c   : > { %1354 = dma.vmem_to_hbm [thread:$0]  (%p1626_p5), %s1806_s26, 1024, %s1804_s22, %s1810_s21, %s1526_s23, %s1526_s23, %s1527_s24  }
 0x44d PF: > { %p1360_p1 = scmp.ge.s32.totalorder %s1519_s20, 2  ;;  %s1173_s25 = sand.u32 1, %s1507_s17  }
 0x44e   : > { %s1174_s29 = scalar_lea.sflag [#allocation3], %s1173_s25 }
 0x44f   : > { %p1357_p2 = pnand %p1360_p1, %p1630_p6 }
 0x451   : > { %1502 = dma.done.wait (!%p1357_p2), %s1174_s29, 1024  }
 0x452   : > { %1504 = vsyncadd (!%p1357_p2), %s1174_s29, 4294966272  ;;  %s1871_s20 = sld [smem:[#allocation6_spill]]  ;;  %s1872_s13 = sld [smem:[#allocation5_spill]] }
 0x453   : > { %s1873_s19 = sld [smem:[#allocation7_spill]]  ;;  %s1874_s17 = smov %s1511_s18 }
 0x458   : > { %p21_p3 = scmp.ge.s32.totalorder %s1871_s20, 4   ;;  %s1875_s18 = smov %s1872_s13 }
 0x45a   :  { %23 = sbr.rel (!%p21_p3) target bundleno = 3 (0x3), region = 99 }
 0x461   :  { %1179 = vsyncpa [#allocation3], 1 }
 0x462   :  { %1181 = vsyncpa [#allocation3 + $0x1], 1 }

// kernel: tpu_custom_call.1
= control target key start
LH: loop header
LB: loop body
LE: loop exit
PB: predicated region body
PF: predicated region fallthrough
CT: control target
= control target key end

     0   :  { %16 = vsyncpa [#allocation3], 0  ;;  %s1851_s0 = inlined_call_operand.vmem [shape: f32[4,16,256], index: 0, kind: input, shape index: {}]   ;;  %s1852_s1 = inlined_call_operand.vmem [shape: bf16[8,16], index: 1, kind: input, shape index: {}]   ;;  %s1853_s2 = inlined_call_operand.vmem [shape: f32[8,1], index: 2, kind: input, shape index: {}]   ;;  %s1854_s3 = inlined_call_operand.vmem [shape: bf16[16,8], index: 3, kind: input, shape index: {}]   ;;  %s1855_s4 = inlined_call_operand.vmem [shape: f32[16,1], index: 4, kind: input, shape index: {}]   ;;  %s1856_s5 = inlined_call_operand.vmem [shape: bf16[16,8], index: 5, kind: input, shape index: {}]   ;;  %s1857_s6 = inlined_call_operand.vmem [shape: f32[16,1], index: 6, kind: input, shape index: {}]   ;;  %s1858_s7 = inlined_call_operand.vmem [shape: bf16[256,32], index: 7, kind: input, shape index: {}]   ;;  %s1859_s8 = inlined_call_operand.vmem [shape: f32[1,32], index: 8, kind: input, shape index: {}]   ;;  %s1860_s9 = inlined_call_operand.vmem [shape: bf16[16,256], index: 9, kind: input, shape index: {}]   ;;  %s1861_s10 = inlined_call_operand.vmem [shape: bf16[16,256], index: 10, kind: input, shape index: {}]   ;;  %s1862_s11 = inlined_call_operand.hbm [shape: f32[4,16,256], index: 11, kind: output, shape index: {}]  }
   0x1   :  { %18 = vsyncpa [#allocation3 + $0x1], 0  ;;  %s1588_s17 = smov 0   ;;  %s1590_s18 = smov 0  }
   0x2   :  { %s1592_s19 = smov 0   ;;  %s1594_s20 = smov 0  }
   0x3 LB: > { %1866 = sst [smem:[#allocation5_spill]] %s1515_s19  ;;  %s1609_s21 = sadd.s32 4294967295, %s1519_s20   ;;  %s1519_s20 = sphi %s1594_s20, %s1871_s20   ;;  %s1515_s19 = sphi %s1592_s19, %s1873_s19   ;;  %s1511_s18 = sphi %s1590_s18, %s1875_s18   ;;  %s1507_s17 = sphi %s1588_s17, %s1874_s17  }
   0x4   : > { %s1220_s22 = sadd.s32 4294967294, %s1519_s20   ;;  %s1613_s23 = sadd.s32 1, %s1519_s20  }
   0x5   : > { %1867 = sst [smem:[#allocation6_spill]] %s1613_s23  ;;  %s267_s24 = sadd.s32 1, %s1515_s19 }
   0x6   : > { %s264_s25 = ssub.s32 %s1519_s20, %s1613_s23  ;;  %p277_p0 = scmp.ne.s32.totalorder %s1515_s19, %s1511_s18 }
   0x7   : > { %p265_p1 = scmp.eq.s32.totalorder %s264_s25, 0  ;;  %p278_p2 = scmp.eq.s32.totalorder %s1609_s21, 1 }
   0x8   : > { %p283_p3 = scmp.ne.s32.totalorder %s1511_s18, %s1507_s17  ;;  %p284_p4 = scmp.eq.s32.totalorder %s1220_s22, 1 }
   0x9   : > { %s1624_s26 = scalar_select %p265_p1, %s1515_s19, %s267_s24  }
   0xa   : > { %p1626_p5 = por %p278_p2, %p277_p0  ;;  %p1630_p6 = por %p284_p4, %p283_p3 }
   0xb   : > { %1868 = sst [smem:[#allocation7_spill]] %s1624_s26  ;;  %p1223_p7 = scmp.ge.s32.totalorder %s1519_s20, 1 }
   0xc   : > { %p342_p8 = scmp.lt.s32.totalorder %s1519_s20, 3 }
   0xe   : > { %p343_p9 = pnand %p1223_p7, %p342_p8 }
   0xf   : > { %v1401_v0 = vld [vmem:[%s1858_s7 + $0x40] sm:$0xff] (!%p343_p9)   ;;  %s1225_s12 = sshll.u32 (!%p343_p9), %s1609_s21, 1  ;;  %v1403_v2 = vld [vmem:[%s1858_s7 + $0x48] sm:$0xff] (!%p343_p9)   ;;  %v1405_v4 = vld [vmem:[%s1858_s7 + $0x50] sm:$0xff] (!%p343_p9)   ;;  %v1521_v28 = vmov (!%p343_p9), 0.0   ;;  %vm1522_vm0 = vmmov (!%p343_p9), 0  }
  0x10   : > { %346 = sbr.rel (%p343_p9) target bundleno = 1101 (0x44d), region = 64  ;;  %v1402_v1 = vld [vmem:[%s1858_s7] sm:$0xff] (!%p343_p9)   ;;  %1278 = vmatprep.subr.bf16.mxu0 (!%p343_p9), %v1401_v0  ;;  %p384_p10 = scmp.lt.s32.totalorder (!%p343_p9), %s1225_s12, 3  ;;  %v1404_v3 = vld [vmem:[%s1858_s7 + $0x8] sm:$0xff] (!%p343_p9)   ;;  %v1406_v5 = vld [vmem:[%s1858_s7 + $0x10] sm:$0xff] (!%p343_p9)   ;;  %1318 = vmatprep.subr.bf16.mxu1 (!%p343_p9), %v1521_v28  ;;  %v1523_v30 = vmov (!%p343_p9), 0  }
  0x11   : > { %1279 = vmatpush3.bf16.msra.mxu0 (!%p343_p9), %v1402_v1  ;;  %v1407_v6 = vld [vmem:[%s1858_s7 + $0x58] sm:$0xff] (!%p343_p9)   ;;  %v1409_v8 = vld [vmem:[%s1858_s7 + $0x60] sm:$0xff] (!%p343_p9)   ;;  %v1411_v10 = vld [vmem:[%s1858_s7 + $0x68] sm:$0xff] (!%p343_p9)   ;;  %1320 = vmatprep.mubr.msk.bf16.mxu1 (!%p343_p9), %vm1522_vm0, %v1521_v28  ;;  %vm584_vm1 = vcmask (!%p343_p9), 130048   ;;  %vm722_vm2 = vcmask (!%p343_p9), 1043456   ;;  %vm718_vm3 = vcmask (!%p343_p9), 64512  }
  0x12   : > { %1280 = vmatprep.subr.bf16.mxu0 (!%p343_p9), %v1403_v2  ;;  %v1408_v7 = vld [vmem:[%s1858_s7 + $0x18] sm:$0xff] (!%p343_p9)   ;;  %v1410_v9 = vld [vmem:[%s1858_s7 + $0x20] sm:$0xff] (!%p343_p9)   ;;  %v1412_v14 = vld [vmem:[%s1858_s7 + $0x28] sm:$0xff] (!%p343_p9)   ;;  %1399 = vset.pattern.permute.xlu0 (!%p343_p9), %v1523_v30  ;;  %s380_s14 = sand.u32 (!%p343_p9), 1, %s1511_s18   ;;  %s1277_s19 = sshll.u32 (!%p343_p9), %s1609_s21, 10 }
  0x13   : > { %v1413_v15 = vld [vmem:[%s1858_s7 + $0x70] sm:$0xff] (!%p343_p9)   ;;  %v1415_v17 = vld [vmem:[%s1858_s7 + $0x78] sm:$0xff] (!%p343_p9)   ;;  %v677_v29 = vld [vmem:[%s1853_s2] sm:$0xff] (!%p343_p9)  ;;  %1400 = vset.pattern.permute.xlu1 (!%p343_p9), %v1523_v30  ;;  %s1804_s22 = scalar_lea.hbm (!%p343_p9), %s1862_s11, %s1277_s19  ;;  %s1810_s21 = scalar_lea.sflag (!%p343_p9), [#allocation3], %s380_s14 }
  0x14   : > { %v1414_v16 = vld [vmem:[%s1858_s7 + $0x30] sm:$0xff] (!%p343_p9)   ;;  %v1416_v18 = vld [vmem:[%s1858_s7 + $0x38] sm:$0xff] (!%p343_p9)   ;;  %680 = vperm.xlu0 (!%p343_p9), %1399, %v677_v29   ;;  %v583_v39 = vld [vmem:[%s1852_s1] sm:$0xf] (!%p343_p9)  ;;  %s1525_s25 = smov (!%p343_p9), [#allocation2]  }
  0x15   : > { %1281 = vmatpush3.bf16.msra.mxu0 (!%p343_p9), %v1404_v3  ;;  %v1246_v46 = vld [vmem:[%s1859_s8] ss:$0 sm:$0xff] (!%p343_p9)  ;;  %s1461_s29 = sshll.u32 (!%p343_p9), %s1525_s25, 4  ;;  %s1462_s29 = int_to_ptr.vmem [resolvable:$false] %s1461_s29 }
  0x16   : > { %1282 = vmatprep.subr.bf16.mxu0 (!%p343_p9), %v1405_v4  ;;  %s1463_s13 = scalar_lea.vmem (!%p343_p9), %s1462_s29, 2048 }
  0x17   : > { %s1877_s12 = smov (!%p384_p10, %s1225_s12), 3 }
  0x18   : > { %s1275_s16 = sshll.u32 %s1877_s12, 5 }
  0x19   : > { %1283 = vmatpush3.bf16.msra.mxu0 %v1406_v5  ;;  %s388_s30 = scalar_lea.vmem %s1851_s0, %s1275_s16  ;;  %s1524_s16 = smov 112   ;;  %v1417_v5 = vld [vmem:[%s1854_s3] sm:$0xff]  }
  0x1a   : > { %1284 = vmatprep.subr.bf16.mxu0 %v1407_v6  ;;  %v1673_v11 = vld [vmem:[%s388_s30 + $0x8] sm:$0xff]  ;;  %v1675_v12 = vld [vmem:[%s388_s30 + $0x18] sm:$0xff]  ;;  %v1694_v19 = vld [vmem:[%s388_s30] sm:$0xff] }
  0x1b   : > { %v401_v13 = vpack.c.bf16 %v1675_v12, %v1673_v11  ;;  %v1696_v20 = vld [vmem:[%s388_s30 + $0x10] sm:$0xff]  ;;  %v1698_v21 = vld [vmem:[%s388_s30 + $0x28] sm:$0xff]  ;;  %v1700_v22 = vld [vmem:[%s388_s30 + $0x38] sm:$0xff] }
  0x1c   : > { %v400_v23 = vpack.c.bf16 %v1696_v20, %v1694_v19  ;;  %v403_v24 = vpack.c.bf16 %v1700_v22, %v1698_v21  ;;  %v1706_v25 = vld [vmem:[%s388_s30 + $0x20] sm:$0xff]  ;;  %v1708_v26 = vld [vmem:[%s388_s30 + $0x30] sm:$0xff]  ;;  %s1224_s30 = sshll.u32 %s380_s14, 6 }
  0x1d   : > { %1285 = vmatpush3.bf16.msra.mxu0 %v1408_v7  ;;  %564 = vmatprep.mubr.bf16.mxu0 %v401_v13  ;;  %v402_v27 = vpack.c.bf16 %v1708_v26, %v1706_v25  ;;  %v702_v7 = vld [vmem:[%s1855_s4 + $0x8] sm:$0xff]  ;;  %s382_s15 = scalar_lea.vmem [#allocation2], %s1224_s30 }
  0x1e   : > { %1286 = vmatprep.subr.bf16.mxu0 %v1409_v8  ;;  %s1158_s26 = sshll.u32 %s382_s15, 4  ;;  %s1806_s26 = int_to_ptr.vmem [resolvable:$true] %s1158_s26 }
  0x1f   : > { %s1457_s24 = scalar_lea.vmem %s1806_s26, 1024  ;;  %p1464_p0 = scmp.lt.s32.totalorder %s1806_s26, %s1462_s29 }
  0x20   : > { %p1458_p11 = scmp.ne.s32.totalorder %s1806_s26, %s1457_s24  ;;  %p1465_p1 = scmp.lt.s32.totalorder %s1463_s13, %s1457_s24 }
  0x21   : > { %1287 = vmatpush3.bf16.msra.mxu0 %v1410_v9 }
  0x22   : > { %1288 = vmatprep.subr.bf16.mxu0 %v1411_v10  ;;  %v836_v10 = vld [vmem:[%s1857_s6 + $0x8] sm:$0xff]  ;;  %p1459_p12 = pnand %p1458_p11, %p1626_p5  ;;  %p1466_p2 = por %p1465_p1, %p1464_p0 }
  0x24   : > { %p1460_p13 = pneg %p1459_p12 }
  0x25   : > { %1289 = vmatpush3.bf16.msra.mxu0 %v1412_v14 }
  0x26   : > { %1290 = vmatprep.subr.bf16.mxu0 %v1413_v15  ;;  %v701_v15 = vld [vmem:[%s1855_s4] sm:$0xff]  ;;  %p1467_p3 = pnand %p1466_p2, %p1460_p13 }
  0x29   : > { %1291 = vmatpush3.bf16.msra.mxu0 %v1414_v16  ;;  %v835_v16 = vld [vmem:[%s1857_s6] sm:$0xff] }
  0x2a   : > { %1292 = vmatprep.subr.bf16.mxu0 %v1415_v17 }
  0x2d   : > { %1293 = vmatpush3.bf16.msra.mxu0 %v1416_v18  ;;  %v1421_v18 = vld [vmem:[%s1860_s9 + $0x4] ss:$8 sps:$4 sm:$0xff]  }
  0x2e   : > { %993 = vmatprep.subr.bf16.mxu0 %v1421_v18 }
  0x30   : > { %565 = vmatmul.mubr.bf16.vlgmr.msra.gmra.mrb[0].mxu0 %v400_v23 }
  0x31   : > { %572 = vmatprep.mubr.bf16.mxu0 %v403_v24  ;;  %v1418_v24 = vld [vmem:[%s1856_s5] sm:$0xff]  }
  0x38   : > { %573 = vmatmul.mubr.bf16.gmra.mrb[4].mxu0 %v402_v27  ;;  %v1419_v27 = vld [vmem:[%s1860_s9] ss:$8 sps:$4 sm:$0xff]  }
  0x39   : > { %1025 = vmatprep.mubr.bf16.mxu0 %v1523_v30  ;;  %994 = vmatpush1.bf16.msra.mxu0 %v1419_v27 }
  0x93   : > { %v681_v48 = vpop.permute.xlu0 %680 }
 0x103   : > { %v1294_v31 = vpop.f32.mrb[0].mxu0 }
 0x104   : > { %v1295_v32 = vpop.f32.mrb[1].mxu0 }
 0x105   : > { %v1296_v33 = vadd.f32 %v1295_v32, %v1294_v31  ;;  %v1297_v34 = vpop.f32.mrb[2].mxu0 }
 0x106   : > { %v1298_v35 = vpop.f32.mrb[3].mxu0 }
 0x107   : > { %v1299_v36 = vadd.f32 %v1298_v35, %v1297_v34 }
 0x109   : > { %v581_v37 = vpack.c.bf16 %v1299_v36, %v1296_v33 }
 0x10b   : > { %v1300_v38 = vpop.f32.mrb[4].mxu0  ;;  %1319 = vmatpush3.bf16.msra.mxu1 %v581_v37 }
 0x10c   : > { %v1301_v40 = vpop.f32.mrb[5].mxu0  ;;  %1324 = vmatprep.subr.bf16.mxu1 %v1521_v28 }
 0x10d   : > { %v1302_v41 = vadd.f32 %v1301_v40, %v1300_v38  ;;  %v1303_v42 = vpop.f32.mrb[6].mxu0 }
 0x10e   : > { %v1304_v43 = vpop.f32.mrb[7].mxu0  ;;  %1321 = vmatmul.mubr.msk.bf16.vlgmr.msra.gmra.mrb[0].mxu1 %vm584_vm1, %v583_v39 }
 0x10f   : > { %v1305_v44 = vadd.f32 %v1304_v43, %v1303_v42  ;;  %1326 = vmatprep.mubr.msk.bf16.mxu1 %vm1522_vm0, %v1521_v28 }
 0x111   : > { %v582_v45 = vpack.c.bf16 %v1305_v44, %v1302_v41 }
 0x113   : > { %1325 = vmatpush3.bf16.msra.mxu1 %v582_v45 }
 0x114   : > { %1330 = vmatprep.subr.bf16.mxu1 %v1521_v28 }
 0x116   : > { %1327 = vmatmul.mubr.msk.bf16.vlgmr.msra.gmra.mrb[4].mxu1 %vm584_vm1, %v583_v39 }
 0x117   : > { %1332 = vmatprep.mubr.msk.bf16.mxu1 %vm1522_vm0, %v1521_v28 }
 0x1e1   : > { %v622_v47 = vpop.f32.mrb[0].mxu1 }
 0x1e2   : > { %v675_v49 = vmul.f32 %v1246_v46, %v622_v47  ;;  %v1322_v50 = vpop.f32.mrb[1].mxu1 }
 0x1e3   : > { %v625_v51 = vpop.f32.mrb[2].mxu1 }
 0x1e4   : > { %v683_v52 = vadd.f32 %v681_v48, %v675_v49  ;;  %v1323_v53 = vpop.f32.mrb[3].mxu1  ;;  %v1424_v49 = vld [vmem:[%s1861_s10 + $0x4] ss:$8 sps:$4 sm:$0xff]   ;;  %v1422_v51 = vld [vmem:[%s1861_s10] ss:$8 sps:$4 sm:$0xff]  }
 0x1e6   : > { %v685_v54 = vadd.f32 3.0, %v683_v52 }
 0x1e8   : > { %v687_v55 = vmax.f32 %v685_v54, 0.0 }
 0x1e9   : > { %v662_v56 = vpop.f32.mrb[4].mxu1 }
 0x1ea   : > { %v689_v57 = vmin.f32 %v687_v55, 6.0  ;;  %v676_v58 = vmul.f32 %v1246_v46, %v662_v56  ;;  %v1328_v59 = vpop.f32.mrb[5].mxu1 }
 0x1eb   : > { %v665_v60 = vpop.f32.mrb[6].mxu1 }
 0x1ec   : > { %v691_v61 = vmul.f32 %v689_v57, %v683_v52  ;;  %v684_v62 = vadd.f32 %v681_v48, %v676_v58  ;;  %v1329_v63 = vpop.f32.mrb[7].mxu1 }
 0x1ee   : > { %v693_v0 = vmul.f32 0.16666667, %v691_v61  ;;  %v686_v1 = vadd.f32 3.0, %v684_v62 }
 0x1f0   : > { %v695_v2 = vpack.c.bf16 %v693_v0, %v693_v0  ;;  %v688_v3 = vmax.f32 %v686_v1, 0.0 }
 0x1f2   : > { %853 = vrot.lane.b32.xlu0 %v695_v2, %s1524_s16  ;;  %v724_v4 = vsel %vm722_vm2, %v695_v2, 0  ;;  %v690_v6 = vmin.f32 %v688_v3, 6.0 }
 0x1f3   : > { %1331 = vmatpush3.bf16.msra.mxu1 %v724_v4 }
 0x1f4   : > { %1336 = vmatprep.subr.bf16.mxu1 %v1521_v28  ;;  %v692_v8 = vmul.f32 %v690_v6, %v684_v62 }
 0x1f6   : > { %710 = vperm.xlu0 %1399, %v702_v7   ;;  %1333 = vmatmul.mubr.msk.bf16.vlgmr.msra.gmra.mrb[8].mxu1 %vm718_vm3, %v1417_v5  ;;  %v694_v9 = vmul.f32 0.16666667, %v692_v8 }
 0x1f7   : > { %1338 = vmatprep.mubr.msk.bf16.mxu1 %vm1522_vm0, %v1521_v28 }
 0x1f8   : > { %v696_v13 = vpack.c.bf16 %v694_v9, %v694_v9 }
 0x1fa   : > { %844 = vperm.xlu0 %1399, %v836_v10   ;;  %903 = vrot.lane.b32.xlu1 %v696_v13, %s1524_s16  ;;  %v768_v14 = vsel %vm722_vm2, %v696_v13, 0 }
 0x1fb   : > { %1337 = vmatpush3.bf16.msra.mxu1 %v768_v14 }
 0x1fc   : > { %1342 = vmatprep.subr.bf16.mxu1 %v1521_v28 }
 0x1fe   : > { %1339 = vmatmul.mubr.msk.bf16.vlgmr.msra.gmra.mrb[12].mxu1 %vm718_vm3, %v1417_v5  ;;  %705 = vperm.xlu1 %1400, %v701_v15  }
 0x1ff   : > { %1344 = vmatprep.mubr.msk.bf16.mxu1 %vm1522_vm0, %v1521_v28 }
 0x202   : > { %839 = vperm.xlu1 %1400, %v835_v16  }
 0x264   : > { %v854_v17 = vpop.permute.xlu0 %853 }
 0x265   : > { %v859_v23 = vsel %vm722_vm2, %v854_v17, 0 }
 0x266   : > { %1343 = vmatpush3.bf16.msra.mxu1 %v859_v23 }
 0x267   : > { %1348 = vmatprep.subr.bf16.mxu1 %v1521_v28 }
 0x269   : > { %1345 = vmatmul.mubr.msk.bf16.vlgmr.msra.gmra.mrb[16].mxu1 %vm718_vm3, %v1418_v24 }
 0x26a   : > { %1350 = vmatprep.mubr.msk.bf16.mxu1 %vm1522_vm0, %v1521_v28 }
 0x26c   : > { %v904_v29 = vpop.permute.xlu1 %903 }
 0x26d   : > { %v906_v31 = vsel %vm722_vm2, %v904_v29, 0 }
 0x26e   : > { %1349 = vmatpush3.bf16.msra.mxu1 %v906_v31 }
 0x26f   : > { %1066 = vmatprep.subr.bf16.mxu1 %v1424_v49 }
 0x271   : > { %1351 = vmatmul.mubr.msk.bf16.vlgmr.msra.gmra.mrb[20].mxu1 %vm718_vm3, %v1418_v24 }
 0x272   : > { %1098 = vmatprep.mubr.bf16.mxu1 %v1523_v30  ;;  %1067 = vmatpush1.bf16.msra.mxu1 %v1422_v51 }
 0x275   : > { %v711_v36 = vpop.permute.xlu0 %710 }
 0x279   : > { %v845_v5 = vpop.permute.xlu0 %844 }
 0x27d   : > { %v706_v32 = vpop.permute.xlu1 %705 }
 0x281   : > { %v840_v2 = vpop.permute.xlu1 %839 }
 0x2c9   : > { %v760_v33 = vpop.f32.mrb[8].mxu1 }
 0x2ca   : > { %v1334_v34 = vpop.f32.mrb[9].mxu1  ;;  %v761_v35 = vadd.f32 %v760_v33, %v706_v32 }
 0x2cb   : > { %v763_v37 = vpop.f32.mrb[10].mxu1 }
 0x2cc   : > { %v1250_v38 = vmul.f32 -1.442695, %v761_v35  ;;  %v764_v39 = vadd.f32 %v763_v37, %v711_v36  ;;  %v1335_v40 = vpop.f32.mrb[11].mxu1 }
 0x2ce   : > { %1425 = vpow2.f32 %v1250_v38  ;;  %v1251_v41 = vmul.f32 -1.442695, %v764_v39 }
 0x2d0   : > { %1427 = vpow2.f32 %v1251_v41 }
 0x2d1   : > { %v804_v28 = vpop.f32.mrb[12].mxu1 }
 0x2d2   : > { %v805_v42 = vadd.f32 %v804_v28, %v706_v32  ;;  %v1340_v43 = vpop.f32.mrb[13].mxu1 }
 0x2d3   : > { %v807_v44 = vpop.f32.mrb[14].mxu1 }
 0x2d4   : > { %v1252_v45 = vmul.f32 -1.442695, %v805_v42  ;;  %v808_v46 = vadd.f32 %v807_v44, %v711_v36  ;;  %v1341_v47 = vpop.f32.mrb[15].mxu1 }
 0x2d6   : > { %1429 = vpow2.f32 %v1252_v45  ;;  %v1253_v48 = vmul.f32 -1.442695, %v808_v46 }
 0x2d8   : > { %v1426_v50 = vpop.eup %1425  ;;  %1431 = vpow2.f32 %v1253_v48 }
 0x2d9   : > { %v823_v52 = vadd.f32 1.0, %v1426_v50 }
 0x2da   : > { %v1428_v53 = vpop.eup %1427 }
 0x2db   : > { %1433 = vrcp.f32 %v823_v52  ;;  %v824_v54 = vadd.f32 1.0, %v1428_v53 }
 0x2dd   : > { %1435 = vrcp.f32 %v824_v54 }
 0x2e0   : > { %v1430_v55 = vpop.eup %1429 }
 0x2e1   : > { %v825_v56 = vadd.f32 1.0, %v1430_v55 }
 0x2e2   : > { %v1432_v57 = vpop.eup %1431 }
 0x2e3   : > { %1437 = vrcp.f32 %v825_v56  ;;  %v826_v58 = vadd.f32 1.0, %v1432_v57 }
 0x2e5   : > { %v1434_v59 = vpop.eup %1433  ;;  %1439 = vrcp.f32 %v826_v58 }
 0x2e7   : > { %v1436_v60 = vpop.eup %1435 }
 0x2e8   : > { %v973_v61 = vpack.c.bf16 %v1436_v60, %v1434_v59 }
 0x2ea   : > { %1263 = vmatmul.mubr.msk.bf16.vlgmr.msra.gmra.mrb[8].mxu0 %vm584_vm1, %v973_v61 }
 0x2eb   : > { %1035 = vmatprep.mubr.bf16.mxu0 %v1523_v30 }
 0x2ed   : > { %v1438_v62 = vpop.eup %1437 }
 0x2ef   : > { %v1440_v63 = vpop.eup %1439 }
 0x2f0   : > { %v974_v0 = vpack.c.bf16 %v1440_v63, %v1438_v62 }
 0x2f2   : > { %1264 = vmatmul.mubr.msk.bf16.gmra.mrb[12].mxu0 %vm584_vm1, %v974_v0 }
 0x33c   : > { %v895_v1 = vpop.f32.mrb[16].mxu1 }
 0x33d   : > { %v1346_v3 = vpop.f32.mrb[17].mxu1  ;;  %v896_v4 = vadd.f32 %v895_v1, %v840_v2 }
 0x33e   : > { %v898_v6 = vpop.f32.mrb[18].mxu1 }
 0x33f   : > { %v1257_v7 = vmul.f32 -1.442695, %v896_v4  ;;  %v899_v8 = vadd.f32 %v898_v6, %v845_v5  ;;  %v1347_v9 = vpop.f32.mrb[19].mxu1 }
 0x341   : > { %1441 = vpow2.f32 %v1257_v7  ;;  %v1258_v10 = vmul.f32 -1.442695, %v899_v8 }
 0x343   : > { %1443 = vpow2.f32 %v1258_v10 }
 0x344   : > { %v942_v13 = vpop.f32.mrb[20].mxu1 }
 0x345   : > { %v943_v14 = vadd.f32 %v942_v13, %v840_v2  ;;  %v1352_v15 = vpop.f32.mrb[21].mxu1 }
 0x346   : > { %v945_v16 = vpop.f32.mrb[22].mxu1 }
 0x347   : > { %v1259_v17 = vmul.f32 -1.442695, %v943_v14  ;;  %v946_v18 = vadd.f32 %v945_v16, %v845_v5  ;;  %v1353_v23 = vpop.f32.mrb[23].mxu1 }
 0x349   : > { %1445 = vpow2.f32 %v1259_v17  ;;  %v1260_v24 = vmul.f32 -1.442695, %v946_v18 }
 0x34b   : > { %v1442_v27 = vpop.eup %1441  ;;  %1447 = vpow2.f32 %v1260_v24 }
 0x34c   : > { %v961_v29 = vadd.f32 1.0, %v1442_v27 }
 0x34d   : > { %v1444_v31 = vpop.eup %1443 }
 0x34e   : > { %v962_v32 = vadd.f32 1.0, %v1444_v31  ;;  %1449 = vrcp.f32 %v961_v29 }
 0x350   : > { %1451 = vrcp.f32 %v962_v32 }
 0x353   : > { %v1446_v33 = vpop.eup %1445 }
 0x354   : > { %v963_v34 = vadd.f32 1.0, %v1446_v33 }
 0x355   : > { %v1448_v35 = vpop.eup %1447 }
 0x356   : > { %v964_v36 = vadd.f32 1.0, %v1448_v35  ;;  %1453 = vrcp.f32 %v963_v34 }
 0x358   : > { %1455 = vrcp.f32 %v964_v36  ;;  %v1450_v37 = vpop.eup %1449 }
 0x35a   : > { %v1452_v38 = vpop.eup %1451 }
 0x35b   : > { %v1046_v39 = vpack.c.bf16 %v1452_v38, %v1450_v37 }
 0x35d   : > { %1267 = vmatmul.mubr.msk.bf16.vlgmr.msra.gmra.mrb[24].mxu1 %vm584_vm1, %v1046_v39 }
 0x35e   : > { %1108 = vmatprep.mubr.bf16.mxu1 %v1523_v30 }
 0x360   : > { %v1454_v40 = vpop.eup %1453 }
 0x362   : > { %v1456_v41 = vpop.eup %1455 }
 0x363   : > { %v1047_v28 = vpack.c.bf16 %v1456_v41, %v1454_v40 }
 0x365   : > { %1268 = vmatmul.mubr.msk.bf16.gmra.mrb[28].mxu1 %vm584_vm1, %v1047_v28 }
 0x3bd   : > { %v1027_v42 = vpop.f32.mrb[8].mxu0 }
 0x3be   : > { %v1029_v43 = vpop.f32.mrb[9].mxu0  ;;  %v1119_v50 = vmul.f32 %v1027_v42, %v1694_v19 }
 0x3bf   : > { %v1031_v44 = vpop.f32.mrb[10].mxu0  ;;  %v1120_v30 = vmul.f32 %v1029_v43, %v1673_v11 }
 0x3c0   : > { %v1033_v45 = vpop.f32.mrb[11].mxu0  ;;  %v1121_v52 = vmul.f32 %v1031_v44, %v1696_v20 }
 0x3c1   : > { %v1122_v55 = vmul.f32 %v1033_v45, %v1675_v12 }
 0x3c5   : > { %v1037_v46 = vpop.f32.mrb[12].mxu0 }
 0x3c6   : > { %v1039_v47 = vpop.f32.mrb[13].mxu0  ;;  %v1123_v11 = vmul.f32 %v1037_v46, %v1706_v25 }
 0x3c7   : > { %v1041_v48 = vpop.f32.mrb[14].mxu0  ;;  %v1124_v19 = vmul.f32 %v1039_v47, %v1698_v21 }
 0x3c8   : > { %v1043_v49 = vpop.f32.mrb[15].mxu0  ;;  %v1125_v12 = vmul.f32 %v1041_v48, %v1708_v26 }
 0x3c9   : > { %v1126_v63 = vmul.f32 %v1043_v49, %v1700_v22 }
 0x430   : > { %v1100_v51 = vpop.f32.mrb[24].mxu1 }
 0x431   : > { %v1127_v53 = vmul.f32 %v1119_v50, %v1100_v51  ;;  %v1102_v54 = vpop.f32.mrb[25].mxu1 }
 0x432   : > { %v1128_v56 = vmul.f32 %v1120_v30, %v1102_v54  ;;  %v1104_v57 = vpop.f32.mrb[26].mxu1 }
 0x433   : > { %1135 = vst [vmem:[%s382_s15] sm:$0xff] %v1127_v53  ;;  %v1129_v58 = vmul.f32 %v1121_v52, %v1104_v57  ;;  %v1106_v59 = vpop.f32.mrb[27].mxu1 }
 0x434   : > { %1136 = vst [vmem:[%s382_s15 + $0x8] sm:$0xff] %v1128_v56  ;;  %v1130_v60 = vmul.f32 %v1122_v55, %v1106_v59 }
 0x435   : > { %1137 = vst [vmem:[%s382_s15 + $0x10] sm:$0xff] %v1129_v58 }
 0x436   : > { %1138 = vst [vmem:[%s382_s15 + $0x18] sm:$0xff] %v1130_v60 }
 0x438   : > { %v1110_v20 = vpop.f32.mrb[28].mxu1 }
 0x439   : > { %v1131_v61 = vmul.f32 %v1123_v11, %v1110_v20  ;;  %v1112_v62 = vpop.f32.mrb[29].mxu1 }
 0x43a   : > { %v1132_v0 = vmul.f32 %v1124_v19, %v1112_v62  ;;  %v1114_v1 = vpop.f32.mrb[30].mxu1 }
 0x43b   : > { %1139 = vst [vmem:[%s382_s15 + $0x20] sm:$0xff] %v1131_v61  ;;  %v1133_v2 = vmul.f32 %v1125_v12, %v1114_v1  ;;  %v1116_v3 = vpop.f32.mrb[31].mxu1 }
 0x43c   : > { %1140 = vst [vmem:[%s382_s15 + $0x28] sm:$0xff] %v1132_v0  ;;  %v1134_v21 = vmul.f32 %v1126_v63, %v1116_v3 }
 0x43d   : > { %1141 = vst [vmem:[%s382_s15 + $0x30] sm:$0xff] %v1133_v2 }
 0x43e   : > { %1142 = vst [vmem:[%s382_s15 + $0x38] sm:$0xff] %v1134_v21 }
 0x43f   : > { %1470 = shalt.err (!%p1467_p3)
}
 0x440   : > { %s1471_s12 = scalar_lea.hbm %s1804_s22, 1024  ;;  %s1475_s15 = scalar_lea.hbm %s1862_s11, 2048 }
 0x441   : > { %p1472_p4 = scmp.ne.s32.totalorder %s1804_s22, %s1471_s12  ;;  %p1476_p9 = scmp.lt.u32.totalorder %s1804_s22, %s1862_s11 }
 0x442   : > { %p1477_p10 = scmp.lt.u32.totalorder %s1475_s15, %s1471_s12  ;;  %p1479_p12 = scmp.lt.u32.totalorder %s1471_s12, %s1804_s22 }
 0x443   : > { %p1473_p7 = pnand %p1472_p4, %p1626_p5 }
 0x444   : > { %p1478_p11 = por %p1477_p10, %p1476_p9 }
 0x445   : > { %p1474_p8 = pneg %p1473_p7 }
 0x446   : > { %p1480_p13 = por %p1479_p12, %p1478_p11 }
 0x448   : > { %p1481_p0 = pnand %p1480_p13, %p1474_p8 }
 0x44a   : > { %1484 = shalt.err (!%p1481_p0)
}
 0x44b   : > { %s1526_s23 = smov 256   ;;  %s1527_s24 = smov 16  }
 0x44c   : > { %1354 = dma.vmem_to_hbm [thread:$0]  (%p1626_p5), %s1806_s26, 1024, %s1804_s22, %s1810_s21, %s1526_s23, %s1526_s23, %s1527_s24  }
 0x44d PF: > { %p1360_p1 = scmp.ge.s32.totalorder %s1519_s20, 2  ;;  %s1173_s25 = sand.u32 1, %s1507_s17  }
 0x44e   : > { %s1174_s29 = scalar_lea.sflag [#allocation3], %s1173_s25 }
 0x44f   : > { %p1357_p2 = pnand %p1360_p1, %p1630_p6 }
 0x451   : > { %1502 = dma.done.wait (!%p1357_p2), %s1174_s29, 1024  }
 0x452   : > { %1504 = vsyncadd (!%p1357_p2), %s1174_s29, 4294966272  ;;  %s1871_s20 = sld [smem:[#allocation6_spill]]  ;;  %s1872_s13 = sld [smem:[#allocation5_spill]] }
 0x453   : > { %s1873_s19 = sld [smem:[#allocation7_spill]]  ;;  %s1874_s17 = smov %s1511_s18 }
 0x458   : > { %p21_p3 = scmp.ge.s32.totalorder %s1871_s20, 4   ;;  %s1875_s18 = smov %s1872_s13 }
 0x45a   :  { %23 = sbr.rel (!%p21_p3) target bundleno = 3 (0x3), region = 99 }
 0x461   :  { %1179 = vsyncpa [#allocation3], 1 }
 0x462   :  { %1181 = vsyncpa [#allocation3 + $0x1], 1 }

</bundles_post_ra>
